<compile_context>
chip_gen: v7x
topology: tpu7x:2x2x1
jax: 0.10.0
libtpu: 0.0.40
codegen_flags: <defaults>
</compile_context>

<pallas_src>
import jax
import jax.numpy as jnp
from jax.experimental import pallas as pl
from jax.experimental.pallas import tpu as pltpu
import numpy as np


# ----------------------------------------------------------------------------
# Fused kernel factory: stacked-LSTM recurrence + linear head.
# Grid = (batch_blocks, time_chunks); h/c carried in VMEM scratch over time.
# ----------------------------------------------------------------------------
def _make_fused_lstm_kernel(num_layers, hp, t_chunk, b_blk, out_dim):
    G = 4 * hp  # gate width (lane-aligned: hp is a multiple of 128)

    def cell(gates, c):
        # PyTorch gate order: i, f, g, o.  Slices are 128-lane aligned.
        i = jax.nn.sigmoid(gates[:, 0 * hp:1 * hp])
        f = jax.nn.sigmoid(gates[:, 1 * hp:2 * hp])
        g = jnp.tanh(gates[:, 2 * hp:3 * hp])
        o = jax.nn.sigmoid(gates[:, 3 * hp:4 * hp])
        c_new = f * c + i * g
        h_new = o * jnp.tanh(c_new)
        return h_new, c_new

    def kernel(*refs):
        # refs layout:
        #   gx0_ref              (Tc, Bb, 4HP)  precomputed x@W_ih0^T + b0 chunk
        #   w_hh0_ref            (HP, 4HP)      bf16
        #   [w_cat_l, b_l]       for l = 1..num_layers-1   (2HP,4HP) bf16 / (1,4HP) f32
        #   w_out_ref            (O, HP)  f32
        #   b_out_ref            (1, O)   f32
        #   y_ref                (Bb, O)  output block
        #   h_sc, c_sc           (L, Bb, HP) f32 VMEM scratch (carry over chunks)
        gx0_ref = refs[0]
        w_hh0_ref = refs[1]
        upper = [refs[2 + 2 * i: 4 + 2 * i] for i in range(num_layers - 1)]
        w_out_ref, b_out_ref, y_ref, h_sc, c_sc = refs[2 + 2 * (num_layers - 1):]

        t_idx = pl.program_id(1)

        # Zero the persistent carry at the first time chunk of this batch block.
        @pl.when(t_idx == 0)
        def _():
            h_sc[...] = jnp.zeros_like(h_sc)
            c_sc[...] = jnp.zeros_like(c_sc)

        # Time-invariant weights: loaded once per chunk (resident in VMEM —
        # constant block index, so no re-DMA across the grid).  Bias broadcast
        # is hoisted here so the unrolled time loop does not re-emit it.
        w_hh0 = w_hh0_ref[...]
        upper_w = [(w_ref[...], jnp.broadcast_to(b_ref[...], (b_blk, G)))
                   for (w_ref, b_ref) in upper]

        hs = [h_sc[l] for l in range(num_layers)]
        cs = [c_sc[l] for l in range(num_layers)]

        def step(t, carry):
            hs, cs = carry
            hs, cs = list(hs), list(cs)
            # Layer 0: input projection + bias precomputed into gx0; only the
            # recurrent (Bb,HP)@(HP,4HP) bf16 matmul sits on the serial path.
            g0 = gx0_ref[t] + jnp.dot(hs[0].astype(w_hh0.dtype), w_hh0,
                                      preferred_element_type=jnp.float32)
            hs[0], cs[0] = cell(g0, cs[0])
            x_l = hs[0]
            # Upper layers: single fused matmul on concat([x, h]) per layer.
            for l, (w_cat, b_b) in enumerate(upper_w, start=1):
                xin = jnp.concatenate([x_l, hs[l]], axis=-1).astype(w_cat.dtype)
                g = jnp.dot(xin, w_cat,
                            preferred_element_type=jnp.float32) + b_b
                hs[l], cs[l] = cell(g, cs[l])
                x_l = hs[l]
            return tuple(hs), tuple(cs)

        hs, cs = jax.lax.fori_loop(0, t_chunk, step,
                                   (tuple(hs), tuple(cs)),
                                   unroll=min(t_chunk, 4))

        # Persist the carry for the next time chunk.
        for l in range(num_layers):
            h_sc[l] = hs[l]
            c_sc[l] = cs[l]

        # Linear head only after the last time chunk (output block written once).
        @pl.when(t_idx == pl.num_programs(1) - 1)
        def _():
            h_top = hs[-1]  # (Bb, HP), padded lanes are exactly zero
            if out_dim == 1:
                # O == 1: VPU multiply + lane reduce instead of a padded MXU
                # matmul whose 1-wide output would force masked stores.
                y_ref[...] = (jnp.sum(h_top * w_out_ref[...], axis=-1,
                                      keepdims=True) + b_out_ref[...])
            else:
                y_ref[...] = (jnp.dot(h_top, w_out_ref[...].T,
                                      preferred_element_type=jnp.float32)
                              + b_out_ref[...])

    return kernel


# ----------------------------------------------------------------------------
# Module forward: one XLA matmul (hoisted input projection) + one pallas_call.
# ----------------------------------------------------------------------------
def lstm_module_forward(x, kp, *, time_chunk=4, batch_block=None):
    """x: (T, B, input_dim) time-major float32. Returns (B, output_dim)."""
    T, B, D = x.shape
    HP = kp["hidden_pad"]
    L = kp["num_layers"]
    O = kp["output_dim"]
    G = 4 * HP

    # Layer-0 input projection hoisted out of the recurrence: one batched
    # (T*B, D) @ (D, 4HP) matmul in plain XLA (state-independent).
    # TODO(synk): for large T*B on v5e/v6e, fold this projection into the
    # per-chunk pipeline inside the kernel to avoid the (T,B,4HP) HBM round trip.
    gx0 = (x.reshape(T * B, D) @ kp["w_ih0_t"] + kp["b0"]).reshape(T, B, G)

    Tc = time_chunk if (0 < time_chunk <= T and T % time_chunk == 0) else T
    Bb = batch_block if (batch_block and B % batch_block == 0) else B
    n_t = T // Tc
    n_b = B // Bb  # set batch_block=B//2 on v7x so both TensorCores get a slice

    args = [gx0, kp["w_hh0_t"]]
    in_specs = [
        pl.BlockSpec((Tc, Bb, G), lambda b, t: (t, b, 0)),
        pl.BlockSpec((HP, G), lambda b, t: (0, 0)),
    ]
    for lp in kp["upper"]:
        args += [lp["w_cat"], lp["b"]]
        in_specs += [pl.BlockSpec((2 * HP, G), lambda b, t: (0, 0)),
                     pl.BlockSpec((1, G), lambda b, t: (0, 0))]
    args += [kp["w_out"], kp["b_out"]]
    in_specs += [pl.BlockSpec((O, HP), lambda b, t: (0, 0)),
                 pl.BlockSpec((1, O), lambda b, t: (0, 0))]

    # VMEM budget: resident weights + double-buffered gx0 chunks + carry scratch.
    # TODO(synk): for production H (e.g. 2048) on v7x (64 MiB VMEM), stream
    # per-layer weights / tile the 4H gate dimension instead of keeping all
    # layers resident; on v5e/v6e (128 MiB) bf16 weights can stay resident.
    def _nb(a):
        return int(a.size) * a.dtype.itemsize
    weight_bytes = sum(_nb(a) for a in args[1:])
    chunk_bytes = Tc * Bb * G * 4          # f32 gx0 chunk
    scratch_bytes = 2 * L * Bb * HP * 4    # h/c carry
    vmem_limit = int(min(100 << 20,
                         max(16 << 20,
                             2 * (weight_bytes + 2 * chunk_bytes + scratch_bytes)
                             + (4 << 20))))

    return pl.pallas_call(
        _make_fused_lstm_kernel(L, HP, Tc, Bb, O),
        out_shape=jax.ShapeDtypeStruct((B, O), jnp.float32),
        grid_spec=pltpu.PrefetchScalarGridSpec(
            num_scalar_prefetch=0,
            grid=(n_b, n_t),
            in_specs=in_specs,
            out_specs=pl.BlockSpec((Bb, O), lambda b, t: (b, 0)),
            scratch_shapes=[pltpu.VMEM((L, Bb, HP), jnp.float32),
                            pltpu.VMEM((L, Bb, HP), jnp.float32)],
        ),
        compiler_params=pltpu.CompilerParams(
            dimension_semantics=("parallel", "arbitrary"),
            vmem_limit_bytes=vmem_limit),
    )(*args)


# ----------------------------------------------------------------------------
# Deterministic raw parameters (PyTorch layout, uniform(-1/sqrt(H), 1/sqrt(H)))
# ----------------------------------------------------------------------------
def init_params(key, input_dim, hidden_dim, output_dim, num_layers):
    bound = 1.0 / np.sqrt(hidden_dim)
    layers = []
    for layer in range(num_layers):
        d_in = input_dim if layer == 0 else hidden_dim
        key, k1, k2, k3, k4 = jax.random.split(key, 5)
        layers.append({
            "w_ih": jax.random.uniform(k1, (4 * hidden_dim, d_in),
                                       jnp.float32, -bound, bound),
            "w_hh": jax.random.uniform(k2, (4 * hidden_dim, hidden_dim),
                                       jnp.float32, -bound, bound),
            "b_ih": jax.random.uniform(k3, (4 * hidden_dim,),
                                       jnp.float32, -bound, bound),
            "b_hh": jax.random.uniform(k4, (4 * hidden_dim,),
                                       jnp.float32, -bound, bound),
        })
    key, k5, k6 = jax.random.split(key, 3)
    w_out = jax.random.uniform(k5, (output_dim, hidden_dim),
                               jnp.float32, -bound, bound)
    b_out = jax.random.uniform(k6, (output_dim,),
                               jnp.float32, -bound, bound)
    return {"layers": layers, "w_out": w_out, "b_out": b_out}


# ----------------------------------------------------------------------------
# Kernel-layout parameter packing: gate-wise lane padding (H -> HP multiple of
# 128), concatenated [W_ih; W_hh] per upper layer, bf16 cast for MXU operands.
# ----------------------------------------------------------------------------
def prepare_kernel_params(raw, input_dim, hidden_dim, output_dim, num_layers,
                          lane=128, weight_dtype=jnp.bfloat16):
    H = hidden_dim
    HP = ((H + lane - 1) // lane) * lane

    def pad_gate_cols(w_t):  # (Din, 4H) -> (Din, 4HP); gate k -> cols [k*HP, k*HP+H)
        blocks = [jnp.pad(w_t[:, k * H:(k + 1) * H], ((0, 0), (0, HP - H)))
                  for k in range(4)]
        return jnp.concatenate(blocks, axis=-1)

    def pad_rows(w, rows):
        return jnp.pad(w, ((0, rows - w.shape[0]), (0, 0)))

    layers = raw["layers"]

    # Layer 0: input projection runs once in XLA -> keep f32 for accuracy.
    l0 = layers[0]
    w_ih0_t = pad_gate_cols(l0["w_ih"].T)                                   # (D, 4HP) f32
    b0 = pad_gate_cols((l0["b_ih"] + l0["b_hh"])[None, :])                  # (1, 4HP) f32
    w_hh0_t = pad_rows(pad_gate_cols(l0["w_hh"].T), HP).astype(weight_dtype)  # (HP, 4HP) bf16

    upper = []
    for lp in layers[1:]:
        w_ih_t = pad_rows(pad_gate_cols(lp["w_ih"].T), HP)                  # (HP, 4HP)
        w_hh_t = pad_rows(pad_gate_cols(lp["w_hh"].T), HP)                  # (HP, 4HP)
        w_cat = jnp.concatenate([w_ih_t, w_hh_t], axis=0).astype(weight_dtype)  # (2HP, 4HP)
        b = pad_gate_cols((lp["b_ih"] + lp["b_hh"])[None, :])               # (1, 4HP) f32
        upper.append({"w_cat": w_cat, "b": b})

    w_out = jnp.pad(raw["w_out"], ((0, 0), (0, HP - H)))                    # (O, HP) f32
    b_out = raw["b_out"][None, :]                                           # (1, O) f32

    return {
        "w_ih0_t": w_ih0_t, "b0": b0, "w_hh0_t": w_hh0_t,
        "upper": upper, "w_out": w_out, "b_out": b_out,
        "hidden_dim": H, "hidden_pad": HP,
        "num_layers": num_layers, "output_dim": output_dim,
    }


# ----------------------------------------------------------------------------
# Pure-JAX f32 reference (PyTorch-faithful), for correctness check.
# ----------------------------------------------------------------------------
def reference_forward(x, raw, hidden_dim):
    H = hidden_dim
    h_seq = x
    for lp in raw["layers"]:
        T, B, _ = h_seq.shape
        w_ih_t, w_hh_t = lp["w_ih"].T, lp["w_hh"].T
        b = (lp["b_ih"] + lp["b_hh"])[None, :]
        h = jnp.zeros((B, H), jnp.float32)
        c = jnp.zeros((B, H), jnp.float32)
        outs = []
        for t in range(T):
            gates = h_seq[t] @ w_ih_t + h @ w_hh_t + b
            i = jax.nn.sigmoid(gates[:, 0 * H:1 * H])
            f = jax.nn.sigmoid(gates[:, 1 * H:2 * H])
            g = jnp.tanh(gates[:, 2 * H:3 * H])
            o = jax.nn.sigmoid(gates[:, 3 * H:4 * H])
            c = f * c + i * g
            h = o * jnp.tanh(c)
            outs.append(h)
        h_seq = jnp.stack(outs, axis=0)
    return h_seq[-1] @ raw["w_out"].T + raw["b_out"][None, :]


if __name__ == "__main__":
    # Small shapes consistent with the module: input (seq_len, batch, input_dim).
    seq_len, batch, input_dim = 8, 2, 4
    hidden_dim, output_dim, num_layers = 32, 1, 2

    key = jax.random.PRNGKey(0)
    key, kx, kp = jax.random.split(key, 3)
    x = jax.random.normal(kx, (seq_len, batch, input_dim), jnp.float32)
    raw = init_params(kp, input_dim, hidden_dim, output_dim, num_layers)
    kparams = prepare_kernel_params(raw, input_dim, hidden_dim,
                                    output_dim, num_layers)

    y = lstm_module_forward(x, kparams, time_chunk=4)
    y = jax.block_until_ready(y)

    # Tolerance loosened vs the pure-f32 reference because the kernel feeds
    # bf16 weights/activations into the MXU (f32 accumulation, f32 h/c carry).
    y_ref = reference_forward(x, raw, hidden_dim)
    np.testing.assert_allclose(np.asarray(y), np.asarray(y_ref),
                               rtol=5e-2, atol=5e-2)
    assert y.shape == (batch, output_dim)
    print("KERNEL_OK")
</pallas_src>

<mosaic_0001>
module attributes {stable_mosaic.version = 11 : i64} {
  func.func @kernel(%arg0: i32, %arg1: i32, %arg2: memref<4x2x512xf32, #tpu.memory_space<vmem>>, %arg3: memref<128x512xbf16, #tpu.memory_space<vmem>>, %arg4: memref<256x512xbf16, #tpu.memory_space<vmem>>, %arg5: memref<1x512xf32, #tpu.memory_space<vmem>>, %arg6: memref<1x128xf32, #tpu.memory_space<vmem>>, %arg7: memref<1x1xf32, #tpu.memory_space<vmem>>, %arg8: memref<2x1xf32, #tpu.memory_space<vmem>>, %arg9: memref<2x2x128xf32, #tpu.memory_space<vmem>>, %arg10: memref<2x2x128xf32, #tpu.memory_space<vmem>>) attributes {dimension_semantics = [#tpu.dimension_semantics<parallel>, #tpu.dimension_semantics<arbitrary>], iteration_bounds = array<i64: 1, 2>, scalar_prefetch = 0 : i64, scratch_operands = 2 : i64, tpu.core_type = #tpu.core_type<tc>, window_params = [{transform_indices = @transform_0, window_bounds = array<i64: 4, 2, 512>}, {pipeline_mode = #tpu.pipeline_mode<synchronous>, transform_indices = @transform_1, window_bounds = array<i64: 128, 512>}, {pipeline_mode = #tpu.pipeline_mode<synchronous>, transform_indices = @transform_2, window_bounds = array<i64: 256, 512>}, {pipeline_mode = #tpu.pipeline_mode<synchronous>, transform_indices = @transform_3, window_bounds = array<i64: 1, 512>}, {pipeline_mode = #tpu.pipeline_mode<synchronous>, transform_indices = @transform_4, window_bounds = array<i64: 1, 128>}, {pipeline_mode = #tpu.pipeline_mode<synchronous>, transform_indices = @transform_5, window_bounds = array<i64: 1, 1>}, {transform_indices = @transform_6, window_bounds = array<i64: 2, 1>}]} {
    %c0_i32 = arith.constant 0 : i32
    %0 = arith.cmpi eq, %arg1, %c0_i32 : i32
    %1 = arith.extui %0 : i1 to i32
    %c0_i32_0 = arith.constant 0 : i32
    %2 = arith.cmpi ne, %1, %c0_i32_0 : i32
    scf.if %2 {
      %cst_71 = arith.constant 0.000000e+00 : f32
      %271 = vector.broadcast %cst_71 : f32 to vector<2x2x128xf32>
      %c0_72 = arith.constant 0 : index
      %c0_73 = arith.constant 0 : index
      %c0_74 = arith.constant 0 : index
      %272 = vector.load %arg9[%c0_72, %c0_73, %c0_74] : memref<2x2x128xf32, #tpu.memory_space<vmem>>, vector<2x2x128xf32>
      tpu.vector_store %arg9[%c0_72, %c0_73, %c0_74], %271 {strides = array<i32>} : memref<2x2x128xf32, #tpu.memory_space<vmem>>, vector<2x2x128xf32>,
      %cst_75 = arith.constant 0.000000e+00 : f32
      %273 = vector.broadcast %cst_75 : f32 to vector<2x2x128xf32>
      %c0_76 = arith.constant 0 : index
      %c0_77 = arith.constant 0 : index
      %c0_78 = arith.constant 0 : index
      %274 = vector.load %arg10[%c0_76, %c0_77, %c0_78] : memref<2x2x128xf32, #tpu.memory_space<vmem>>, vector<2x2x128xf32>
      tpu.vector_store %arg10[%c0_76, %c0_77, %c0_78], %273 {strides = array<i32>} : memref<2x2x128xf32, #tpu.memory_space<vmem>>, vector<2x2x128xf32>,
    } else {
    }
    %c0 = arith.constant 0 : index
    %c0_1 = arith.constant 0 : index
    %3 = vector.load %arg3[%c0, %c0_1] : memref<128x512xbf16, #tpu.memory_space<vmem>>, vector<128x512xbf16>
    %c0_2 = arith.constant 0 : index
    %c0_3 = arith.constant 0 : index
    %4 = vector.load %arg4[%c0_2, %c0_3] : memref<256x512xbf16, #tpu.memory_space<vmem>>, vector<256x512xbf16>
    %c0_4 = arith.constant 0 : index
    %c0_5 = arith.constant 0 : index
    %5 = vector.load %arg5[%c0_4, %c0_5] : memref<1x512xf32, #tpu.memory_space<vmem>>, vector<1x512xf32>
    %6 = vector.shape_cast %5 : vector<1x512xf32> to vector<1x512xf32>
    %7 = vector.broadcast %6 : vector<1x512xf32> to vector<2x512xf32>
    %c0_6 = arith.constant 0 : index
    %c0_7 = arith.constant 0 : index
    %c0_8 = arith.constant 0 : index
    %8 = vector.load %arg9[%c0_6, %c0_7, %c0_8] : memref<2x2x128xf32, #tpu.memory_space<vmem>>, vector<1x2x128xf32>
    %9 = vector.shape_cast %8 : vector<1x2x128xf32> to vector<2x128xf32>
    %c1 = arith.constant 1 : index
    %c0_9 = arith.constant 0 : index
    %c0_10 = arith.constant 0 : index
    %10 = vector.load %arg9[%c1, %c0_9, %c0_10] : memref<2x2x128xf32, #tpu.memory_space<vmem>>, vector<1x2x128xf32>
    %11 = vector.shape_cast %10 : vector<1x2x128xf32> to vector<2x128xf32>
    %c0_11 = arith.constant 0 : index
    %c0_12 = arith.constant 0 : index
    %c0_13 = arith.constant 0 : index
    %12 = vector.load %arg10[%c0_11, %c0_12, %c0_13] : memref<2x2x128xf32, #tpu.memory_space<vmem>>, vector<1x2x128xf32>
    %13 = vector.shape_cast %12 : vector<1x2x128xf32> to vector<2x128xf32>
    %c1_14 = arith.constant 1 : index
    %c0_15 = arith.constant 0 : index
    %c0_16 = arith.constant 0 : index
    %14 = vector.load %arg10[%c1_14, %c0_15, %c0_16] : memref<2x2x128xf32, #tpu.memory_space<vmem>>, vector<1x2x128xf32>
    %15 = vector.shape_cast %14 : vector<1x2x128xf32> to vector<2x128xf32>
    %c0_i32_17 = arith.constant 0 : i32
    %16 = arith.index_cast %c0_i32_17 : i32 to index
    %c0_18 = arith.constant 0 : index
    %c0_19 = arith.constant 0 : index
    %17 = vector.load %arg2[%16, %c0_18, %c0_19] : memref<4x2x512xf32, #tpu.memory_space<vmem>>, vector<1x2x512xf32>
    %18 = vector.shape_cast %17 : vector<1x2x512xf32> to vector<2x512xf32>
    %19 = arith.truncf %9 : vector<2x128xf32> to vector<2x128xbf16>
    %cst = arith.constant dense<0.000000e+00> : vector<2x512xf32>
    %20 = tpu.matmul %19, %3, %cst {dimension_numbers = #tpu.dot_dimension_numbers<[1], [0], [0], [1], [0, 0, 1, 1], [], []>} : vector<2x128xbf16>, vector<128x512xbf16>, vector<2x512xf32> -> vector<2x512xf32>
    %21 = arith.addf %18, %20 : vector<2x512xf32>
    %22 = vector.extract_strided_slice %21 {offsets = [0, 0], sizes = [2, 128], strides = [1, 1]} : vector<2x512xf32> to vector<2x128xf32>
    %23 = arith.negf %22 : vector<2x128xf32>
    %24 = math.exp %23 : vector<2x128xf32>
    %cst_20 = arith.constant 1.000000e+00 : f32
    %25 = vector.broadcast %cst_20 : f32 to vector<2x128xf32>
    %26 = arith.addf %25, %24 : vector<2x128xf32>
    %27 = arith.divf %25, %26 : vector<2x128xf32>
    %28 = vector.extract_strided_slice %21 {offsets = [0, 128], sizes = [2, 128], strides = [1, 1]} : vector<2x512xf32> to vector<2x128xf32>
    %29 = arith.negf %28 : vector<2x128xf32>
    %30 = math.exp %29 : vector<2x128xf32>
    %cst_21 = arith.constant 1.000000e+00 : f32
    %31 = vector.broadcast %cst_21 : f32 to vector<2x128xf32>
    %32 = arith.addf %31, %30 : vector<2x128xf32>
    %33 = arith.divf %31, %32 : vector<2x128xf32>
    %34 = vector.extract_strided_slice %21 {offsets = [0, 256], sizes = [2, 128], strides = [1, 1]} : vector<2x512xf32> to vector<2x128xf32>
    %35 = math.tanh %34 : vector<2x128xf32>
    %36 = vector.extract_strided_slice %21 {offsets = [0, 384], sizes = [2, 128], strides = [1, 1]} : vector<2x512xf32> to vector<2x128xf32>
    %37 = arith.negf %36 : vector<2x128xf32>
    %38 = math.exp %37 : vector<2x128xf32>
    %cst_22 = arith.constant 1.000000e+00 : f32
    %39 = vector.broadcast %cst_22 : f32 to vector<2x128xf32>
    %40 = arith.addf %39, %38 : vector<2x128xf32>
    %41 = arith.divf %39, %40 : vector<2x128xf32>
    %42 = arith.mulf %33, %13 : vector<2x128xf32>
    %43 = arith.mulf %27, %35 : vector<2x128xf32>
    %44 = arith.addf %42, %43 : vector<2x128xf32>
    %45 = math.tanh %44 : vector<2x128xf32>
    %46 = arith.mulf %41, %45 : vector<2x128xf32>
    %47 = tpu.concatenate %46, %11 in 1 : vector<2x128xf32>, vector<2x128xf32> -> vector<2x256xf32>
    %48 = arith.truncf %47 : vector<2x256xf32> to vector<2x256xbf16>
    %cst_23 = arith.constant dense<0.000000e+00> : vector<2x512xf32>
    %49 = tpu.matmul %48, %4, %cst_23 {dimension_numbers = #tpu.dot_dimension_numbers<[1], [0], [0], [1], [0, 0, 1, 1], [], []>} : vector<2x256xbf16>, vector<256x512xbf16>, vector<2x512xf32> -> vector<2x512xf32>
    %50 = arith.addf %49, %7 : vector<2x512xf32>
    %51 = vector.extract_strided_slice %50 {offsets = [0, 0], sizes = [2, 128], strides = [1, 1]} : vector<2x512xf32> to vector<2x128xf32>
    %52 = arith.negf %51 : vector<2x128xf32>
    %53 = math.exp %52 : vector<2x128xf32>
    %cst_24 = arith.constant 1.000000e+00 : f32
    %54 = vector.broadcast %cst_24 : f32 to vector<2x128xf32>
    %55 = arith.addf %54, %53 : vector<2x128xf32>
    %56 = arith.divf %54, %55 : vector<2x128xf32>
    %57 = vector.extract_strided_slice %50 {offsets = [0, 128], sizes = [2, 128], strides = [1, 1]} : vector<2x512xf32> to vector<2x128xf32>
    %58 = arith.negf %57 : vector<2x128xf32>
    %59 = math.exp %58 : vector<2x128xf32>
    %cst_25 = arith.constant 1.000000e+00 : f32
    %60 = vector.broadcast %cst_25 : f32 to vector<2x128xf32>
    %61 = arith.addf %60, %59 : vector<2x128xf32>
    %62 = arith.divf %60, %61 : vector<2x128xf32>
    %63 = vector.extract_strided_slice %50 {offsets = [0, 256], sizes = [2, 128], strides = [1, 1]} : vector<2x512xf32> to vector<2x128xf32>
    %64 = math.tanh %63 : vector<2x128xf32>
    %65 = vector.extract_strided_slice %50 {offsets = [0, 384], sizes = [2, 128], strides = [1, 1]} : vector<2x512xf32> to vector<2x128xf32>
    %66 = arith.negf %65 : vector<2x128xf32>
    %67 = math.exp %66 : vector<2x128xf32>
    %cst_26 = arith.constant 1.000000e+00 : f32
    %68 = vector.broadcast %cst_26 : f32 to vector<2x128xf32>
    %69 = arith.addf %68, %67 : vector<2x128xf32>
    %70 = arith.divf %68, %69 : vector<2x128xf32>
    %71 = arith.mulf %62, %15 : vector<2x128xf32>
    %72 = arith.mulf %56, %64 : vector<2x128xf32>
    %73 = arith.addf %71, %72 : vector<2x128xf32>
    %74 = math.tanh %73 : vector<2x128xf32>
    %75 = arith.mulf %70, %74 : vector<2x128xf32>
    %c1_i32 = arith.constant 1 : i32
    %76 = arith.index_cast %c1_i32 : i32 to index
    %c0_27 = arith.constant 0 : index
    %c0_28 = arith.constant 0 : index
    %77 = vector.load %arg2[%76, %c0_27, %c0_28] : memref<4x2x512xf32, #tpu.memory_space<vmem>>, vector<1x2x512xf32>
    %78 = vector.shape_cast %77 : vector<1x2x512xf32> to vector<2x512xf32>
    %79 = arith.truncf %46 : vector<2x128xf32> to vector<2x128xbf16>
    %cst_29 = arith.constant dense<0.000000e+00> : vector<2x512xf32>
    %80 = tpu.matmul %79, %3, %cst_29 {dimension_numbers = #tpu.dot_dimension_numbers<[1], [0], [0], [1], [0, 0, 1, 1], [], []>} : vector<2x128xbf16>, vector<128x512xbf16>, vector<2x512xf32> -> vector<2x512xf32>
    %81 = arith.addf %78, %80 : vector<2x512xf32>
    %82 = vector.extract_strided_slice %81 {offsets = [0, 0], sizes = [2, 128], strides = [1, 1]} : vector<2x512xf32> to vector<2x128xf32>
    %83 = arith.negf %82 : vector<2x128xf32>
    %84 = math.exp %83 : vector<2x128xf32>
    %cst_30 = arith.constant 1.000000e+00 : f32
    %85 = vector.broadcast %cst_30 : f32 to vector<2x128xf32>
    %86 = arith.addf %85, %84 : vector<2x128xf32>
    %87 = arith.divf %85, %86 : vector<2x128xf32>
    %88 = vector.extract_strided_slice %81 {offsets = [0, 128], sizes = [2, 128], strides = [1, 1]} : vector<2x512xf32> to vector<2x128xf32>
    %89 = arith.negf %88 : vector<2x128xf32>
    %90 = math.exp %89 : vector<2x128xf32>
    %cst_31 = arith.constant 1.000000e+00 : f32
    %91 = vector.broadcast %cst_31 : f32 to vector<2x128xf32>
    %92 = arith.addf %91, %90 : vector<2x128xf32>
    %93 = arith.divf %91, %92 : vector<2x128xf32>
    %94 = vector.extract_strided_slice %81 {offsets = [0, 256], sizes = [2, 128], strides = [1, 1]} : vector<2x512xf32> to vector<2x128xf32>
    %95 = math.tanh %94 : vector<2x128xf32>
    %96 = vector.extract_strided_slice %81 {offsets = [0, 384], sizes = [2, 128], strides = [1, 1]} : vector<2x512xf32> to vector<2x128xf32>
    %97 = arith.negf %96 : vector<2x128xf32>
    %98 = math.exp %97 : vector<2x128xf32>
    %cst_32 = arith.constant 1.000000e+00 : f32
    %99 = vector.broadcast %cst_32 : f32 to vector<2x128xf32>
    %100 = arith.addf %99, %98 : vector<2x128xf32>
    %101 = arith.divf %99, %100 : vector<2x128xf32>
    %102 = arith.mulf %93, %44 : vector<2x128xf32>
    %103 = arith.mulf %87, %95 : vector<2x128xf32>
    %104 = arith.addf %102, %103 : vector<2x128xf32>
    %105 = math.tanh %104 : vector<2x128xf32>
    %106 = arith.mulf %101, %105 : vector<2x128xf32>
    %107 = tpu.concatenate %106, %75 in 1 : vector<2x128xf32>, vector<2x128xf32> -> vector<2x256xf32>
    %108 = arith.truncf %107 : vector<2x256xf32> to vector<2x256xbf16>
    %cst_33 = arith.constant dense<0.000000e+00> : vector<2x512xf32>
    %109 = tpu.matmul %108, %4, %cst_33 {dimension_numbers = #tpu.dot_dimension_numbers<[1], [0], [0], [1], [0, 0, 1, 1], [], []>} : vector<2x256xbf16>, vector<256x512xbf16>, vector<2x512xf32> -> vector<2x512xf32>
    %110 = arith.addf %109, %7 : vector<2x512xf32>
    %111 = vector.extract_strided_slice %110 {offsets = [0, 0], sizes = [2, 128], strides = [1, 1]} : vector<2x512xf32> to vector<2x128xf32>
    %112 = arith.negf %111 : vector<2x128xf32>
    %113 = math.exp %112 : vector<2x128xf32>
    %cst_34 = arith.constant 1.000000e+00 : f32
    %114 = vector.broadcast %cst_34 : f32 to vector<2x128xf32>
    %115 = arith.addf %114, %113 : vector<2x128xf32>
    %116 = arith.divf %114, %115 : vector<2x128xf32>
    %117 = vector.extract_strided_slice %110 {offsets = [0, 128], sizes = [2, 128], strides = [1, 1]} : vector<2x512xf32> to vector<2x128xf32>
    %118 = arith.negf %117 : vector<2x128xf32>
    %119 = math.exp %118 : vector<2x128xf32>
    %cst_35 = arith.constant 1.000000e+00 : f32
    %120 = vector.broadcast %cst_35 : f32 to vector<2x128xf32>
    %121 = arith.addf %120, %119 : vector<2x128xf32>
    %122 = arith.divf %120, %121 : vector<2x128xf32>
    %123 = vector.extract_strided_slice %110 {offsets = [0, 256], sizes = [2, 128], strides = [1, 1]} : vector<2x512xf32> to vector<2x128xf32>
    %124 = math.tanh %123 : vector<2x128xf32>
    %125 = vector.extract_strided_slice %110 {offsets = [0, 384], sizes = [2, 128], strides = [1, 1]} : vector<2x512xf32> to vector<2x128xf32>
    %126 = arith.negf %125 : vector<2x128xf32>
    %127 = math.exp %126 : vector<2x128xf32>
    %cst_36 = arith.constant 1.000000e+00 : f32
    %128 = vector.broadcast %cst_36 : f32 to vector<2x128xf32>
    %129 = arith.addf %128, %127 : vector<2x128xf32>
    %130 = arith.divf %128, %129 : vector<2x128xf32>
    %131 = arith.mulf %122, %73 : vector<2x128xf32>
    %132 = arith.mulf %116, %124 : vector<2x128xf32>
    %133 = arith.addf %131, %132 : vector<2x128xf32>
    %134 = math.tanh %133 : vector<2x128xf32>
    %135 = arith.mulf %130, %134 : vector<2x128xf32>
    %c2_i32 = arith.constant 2 : i32
    %136 = arith.index_cast %c2_i32 : i32 to index
    %c0_37 = arith.constant 0 : index
    %c0_38 = arith.constant 0 : index
    %137 = vector.load %arg2[%136, %c0_37, %c0_38] : memref<4x2x512xf32, #tpu.memory_space<vmem>>, vector<1x2x512xf32>
    %138 = vector.shape_cast %137 : vector<1x2x512xf32> to vector<2x512xf32>
    %139 = arith.truncf %106 : vector<2x128xf32> to vector<2x128xbf16>
    %cst_39 = arith.constant dense<0.000000e+00> : vector<2x512xf32>
    %140 = tpu.matmul %139, %3, %cst_39 {dimension_numbers = #tpu.dot_dimension_numbers<[1], [0], [0], [1], [0, 0, 1, 1], [], []>} : vector<2x128xbf16>, vector<128x512xbf16>, vector<2x512xf32> -> vector<2x512xf32>
    %141 = arith.addf %138, %140 : vector<2x512xf32>
    %142 = vector.extract_strided_slice %141 {offsets = [0, 0], sizes = [2, 128], strides = [1, 1]} : vector<2x512xf32> to vector<2x128xf32>
    %143 = arith.negf %142 : vector<2x128xf32>
    %144 = math.exp %143 : vector<2x128xf32>
    %cst_40 = arith.constant 1.000000e+00 : f32
    %145 = vector.broadcast %cst_40 : f32 to vector<2x128xf32>
    %146 = arith.addf %145, %144 : vector<2x128xf32>
    %147 = arith.divf %145, %146 : vector<2x128xf32>
    %148 = vector.extract_strided_slice %141 {offsets = [0, 128], sizes = [2, 128], strides = [1, 1]} : vector<2x512xf32> to vector<2x128xf32>
    %149 = arith.negf %148 : vector<2x128xf32>
    %150 = math.exp %149 : vector<2x128xf32>
    %cst_41 = arith.constant 1.000000e+00 : f32
    %151 = vector.broadcast %cst_41 : f32 to vector<2x128xf32>
    %152 = arith.addf %151, %150 : vector<2x128xf32>
    %153 = arith.divf %151, %152 : vector<2x128xf32>
    %154 = vector.extract_strided_slice %141 {offsets = [0, 256], sizes = [2, 128], strides = [1, 1]} : vector<2x512xf32> to vector<2x128xf32>
    %155 = math.tanh %154 : vector<2x128xf32>
    %156 = vector.extract_strided_slice %141 {offsets = [0, 384], sizes = [2, 128], strides = [1, 1]} : vector<2x512xf32> to vector<2x128xf32>
    %157 = arith.negf %156 : vector<2x128xf32>
    %158 = math.exp %157 : vector<2x128xf32>
    %cst_42 = arith.constant 1.000000e+00 : f32
    %159 = vector.broadcast %cst_42 : f32 to vector<2x128xf32>
    %160 = arith.addf %159, %158 : vector<2x128xf32>
    %161 = arith.divf %159, %160 : vector<2x128xf32>
    %162 = arith.mulf %153, %104 : vector<2x128xf32>
    %163 = arith.mulf %147, %155 : vector<2x128xf32>
    %164 = arith.addf %162, %163 : vector<2x128xf32>
    %165 = math.tanh %164 : vector<2x128xf32>
    %166 = arith.mulf %161, %165 : vector<2x128xf32>
    %167 = tpu.concatenate %166, %135 in 1 : vector<2x128xf32>, vector<2x128xf32> -> vector<2x256xf32>
    %168 = arith.truncf %167 : vector<2x256xf32> to vector<2x256xbf16>
    %cst_43 = arith.constant dense<0.000000e+00> : vector<2x512xf32>
    %169 = tpu.matmul %168, %4, %cst_43 {dimension_numbers = #tpu.dot_dimension_numbers<[1], [0], [0], [1], [0, 0, 1, 1], [], []>} : vector<2x256xbf16>, vector<256x512xbf16>, vector<2x512xf32> -> vector<2x512xf32>
    %170 = arith.addf %169, %7 : vector<2x512xf32>
    %171 = vector.extract_strided_slice %170 {offsets = [0, 0], sizes = [2, 128], strides = [1, 1]} : vector<2x512xf32> to vector<2x128xf32>
    %172 = arith.negf %171 : vector<2x128xf32>
    %173 = math.exp %172 : vector<2x128xf32>
    %cst_44 = arith.constant 1.000000e+00 : f32
    %174 = vector.broadcast %cst_44 : f32 to vector<2x128xf32>
    %175 = arith.addf %174, %173 : vector<2x128xf32>
    %176 = arith.divf %174, %175 : vector<2x128xf32>
    %177 = vector.extract_strided_slice %170 {offsets = [0, 128], sizes = [2, 128], strides = [1, 1]} : vector<2x512xf32> to vector<2x128xf32>
    %178 = arith.negf %177 : vector<2x128xf32>
    %179 = math.exp %178 : vector<2x128xf32>
    %cst_45 = arith.constant 1.000000e+00 : f32
    %180 = vector.broadcast %cst_45 : f32 to vector<2x128xf32>
    %181 = arith.addf %180, %179 : vector<2x128xf32>
    %182 = arith.divf %180, %181 : vector<2x128xf32>
    %183 = vector.extract_strided_slice %170 {offsets = [0, 256], sizes = [2, 128], strides = [1, 1]} : vector<2x512xf32> to vector<2x128xf32>
    %184 = math.tanh %183 : vector<2x128xf32>
    %185 = vector.extract_strided_slice %170 {offsets = [0, 384], sizes = [2, 128], strides = [1, 1]} : vector<2x512xf32> to vector<2x128xf32>
    %186 = arith.negf %185 : vector<2x128xf32>
    %187 = math.exp %186 : vector<2x128xf32>
    %cst_46 = arith.constant 1.000000e+00 : f32
    %188 = vector.broadcast %cst_46 : f32 to vector<2x128xf32>
    %189 = arith.addf %188, %187 : vector<2x128xf32>
    %190 = arith.divf %188, %189 : vector<2x128xf32>
    %191 = arith.mulf %182, %133 : vector<2x128xf32>
    %192 = arith.mulf %176, %184 : vector<2x128xf32>
    %193 = arith.addf %191, %192 : vector<2x128xf32>
    %194 = math.tanh %193 : vector<2x128xf32>
    %195 = arith.mulf %190, %194 : vector<2x128xf32>
    %c3_i32 = arith.constant 3 : i32
    %196 = arith.index_cast %c3_i32 : i32 to index
    %c0_47 = arith.constant 0 : index
    %c0_48 = arith.constant 0 : index
    %197 = vector.load %arg2[%196, %c0_47, %c0_48] : memref<4x2x512xf32, #tpu.memory_space<vmem>>, vector<1x2x512xf32>
    %198 = vector.shape_cast %197 : vector<1x2x512xf32> to vector<2x512xf32>
    %199 = arith.truncf %166 : vector<2x128xf32> to vector<2x128xbf16>
    %cst_49 = arith.constant dense<0.000000e+00> : vector<2x512xf32>
    %200 = tpu.matmul %199, %3, %cst_49 {dimension_numbers = #tpu.dot_dimension_numbers<[1], [0], [0], [1], [0, 0, 1, 1], [], []>} : vector<2x128xbf16>, vector<128x512xbf16>, vector<2x512xf32> -> vector<2x512xf32>
    %201 = arith.addf %198, %200 : vector<2x512xf32>
    %202 = vector.extract_strided_slice %201 {offsets = [0, 0], sizes = [2, 128], strides = [1, 1]} : vector<2x512xf32> to vector<2x128xf32>
    %203 = arith.negf %202 : vector<2x128xf32>
    %204 = math.exp %203 : vector<2x128xf32>
    %cst_50 = arith.constant 1.000000e+00 : f32
    %205 = vector.broadcast %cst_50 : f32 to vector<2x128xf32>
    %206 = arith.addf %205, %204 : vector<2x128xf32>
    %207 = arith.divf %205, %206 : vector<2x128xf32>
    %208 = vector.extract_strided_slice %201 {offsets = [0, 128], sizes = [2, 128], strides = [1, 1]} : vector<2x512xf32> to vector<2x128xf32>
    %209 = arith.negf %208 : vector<2x128xf32>
    %210 = math.exp %209 : vector<2x128xf32>
    %cst_51 = arith.constant 1.000000e+00 : f32
    %211 = vector.broadcast %cst_51 : f32 to vector<2x128xf32>
    %212 = arith.addf %211, %210 : vector<2x128xf32>
    %213 = arith.divf %211, %212 : vector<2x128xf32>
    %214 = vector.extract_strided_slice %201 {offsets = [0, 256], sizes = [2, 128], strides = [1, 1]} : vector<2x512xf32> to vector<2x128xf32>
    %215 = math.tanh %214 : vector<2x128xf32>
    %216 = vector.extract_strided_slice %201 {offsets = [0, 384], sizes = [2, 128], strides = [1, 1]} : vector<2x512xf32> to vector<2x128xf32>
    %217 = arith.negf %216 : vector<2x128xf32>
    %218 = math.exp %217 : vector<2x128xf32>
    %cst_52 = arith.constant 1.000000e+00 : f32
    %219 = vector.broadcast %cst_52 : f32 to vector<2x128xf32>
    %220 = arith.addf %219, %218 : vector<2x128xf32>
    %221 = arith.divf %219, %220 : vector<2x128xf32>
    %222 = arith.mulf %213, %164 : vector<2x128xf32>
    %223 = arith.mulf %207, %215 : vector<2x128xf32>
    %224 = arith.addf %222, %223 : vector<2x128xf32>
    %225 = math.tanh %224 : vector<2x128xf32>
    %226 = arith.mulf %221, %225 : vector<2x128xf32>
    %227 = tpu.concatenate %226, %195 in 1 : vector<2x128xf32>, vector<2x128xf32> -> vector<2x256xf32>
    %228 = arith.truncf %227 : vector<2x256xf32> to vector<2x256xbf16>
    %cst_53 = arith.constant dense<0.000000e+00> : vector<2x512xf32>
    %229 = tpu.matmul %228, %4, %cst_53 {dimension_numbers = #tpu.dot_dimension_numbers<[1], [0], [0], [1], [0, 0, 1, 1], [], []>} : vector<2x256xbf16>, vector<256x512xbf16>, vector<2x512xf32> -> vector<2x512xf32>
    %230 = arith.addf %229, %7 : vector<2x512xf32>
    %231 = vector.extract_strided_slice %230 {offsets = [0, 0], sizes = [2, 128], strides = [1, 1]} : vector<2x512xf32> to vector<2x128xf32>
    %232 = arith.negf %231 : vector<2x128xf32>
    %233 = math.exp %232 : vector<2x128xf32>
    %cst_54 = arith.constant 1.000000e+00 : f32
    %234 = vector.broadcast %cst_54 : f32 to vector<2x128xf32>
    %235 = arith.addf %234, %233 : vector<2x128xf32>
    %236 = arith.divf %234, %235 : vector<2x128xf32>
    %237 = vector.extract_strided_slice %230 {offsets = [0, 128], sizes = [2, 128], strides = [1, 1]} : vector<2x512xf32> to vector<2x128xf32>
    %238 = arith.negf %237 : vector<2x128xf32>
    %239 = math.exp %238 : vector<2x128xf32>
    %cst_55 = arith.constant 1.000000e+00 : f32
    %240 = vector.broadcast %cst_55 : f32 to vector<2x128xf32>
    %241 = arith.addf %240, %239 : vector<2x128xf32>
    %242 = arith.divf %240, %241 : vector<2x128xf32>
    %243 = vector.extract_strided_slice %230 {offsets = [0, 256], sizes = [2, 128], strides = [1, 1]} : vector<2x512xf32> to vector<2x128xf32>
    %244 = math.tanh %243 : vector<2x128xf32>
    %245 = vector.extract_strided_slice %230 {offsets = [0, 384], sizes = [2, 128], strides = [1, 1]} : vector<2x512xf32> to vector<2x128xf32>
    %246 = arith.negf %245 : vector<2x128xf32>
    %247 = math.exp %246 : vector<2x128xf32>
    %cst_56 = arith.constant 1.000000e+00 : f32
    %248 = vector.broadcast %cst_56 : f32 to vector<2x128xf32>
    %249 = arith.addf %248, %247 : vector<2x128xf32>
    %250 = arith.divf %248, %249 : vector<2x128xf32>
    %251 = arith.mulf %242, %193 : vector<2x128xf32>
    %252 = arith.mulf %236, %244 : vector<2x128xf32>
    %253 = arith.addf %251, %252 : vector<2x128xf32>
    %254 = math.tanh %253 : vector<2x128xf32>
    %255 = arith.mulf %250, %254 : vector<2x128xf32>
    %c4_i32 = arith.constant 4 : i32
    %c0_57 = arith.constant 0 : index
    %c0_58 = arith.constant 0 : index
    %c0_59 = arith.constant 0 : index
    %256 = vector.load %arg9[%c0_57, %c0_58, %c0_59] : memref<2x2x128xf32, #tpu.memory_space<vmem>>, vector<1x2x128xf32>
    %257 = vector.shape_cast %256 : vector<1x2x128xf32> to vector<2x128xf32>
    %258 = vector.shape_cast %226 : vector<2x128xf32> to vector<1x2x128xf32>
    tpu.vector_store %arg9[%c0_57, %c0_58, %c0_59], %258 {strides = array<i32>} : memref<2x2x128xf32, #tpu.memory_space<vmem>>, vector<1x2x128xf32>,
    %c0_60 = arith.constant 0 : index
    %c0_61 = arith.constant 0 : index
    %c0_62 = arith.constant 0 : index
    %259 = vector.load %arg10[%c0_60, %c0_61, %c0_62] : memref<2x2x128xf32, #tpu.memory_space<vmem>>, vector<1x2x128xf32>
    %260 = vector.shape_cast %259 : vector<1x2x128xf32> to vector<2x128xf32>
    %261 = vector.shape_cast %224 : vector<2x128xf32> to vector<1x2x128xf32>
    tpu.vector_store %arg10[%c0_60, %c0_61, %c0_62], %261 {strides = array<i32>} : memref<2x2x128xf32, #tpu.memory_space<vmem>>, vector<1x2x128xf32>,
    %c1_63 = arith.constant 1 : index
    %c0_64 = arith.constant 0 : index
    %c0_65 = arith.constant 0 : index
    %262 = vector.load %arg9[%c1_63, %c0_64, %c0_65] : memref<2x2x128xf32, #tpu.memory_space<vmem>>, vector<1x2x128xf32>
    %263 = vector.shape_cast %262 : vector<1x2x128xf32> to vector<2x128xf32>
    %264 = vector.shape_cast %255 : vector<2x128xf32> to vector<1x2x128xf32>
    tpu.vector_store %arg9[%c1_63, %c0_64, %c0_65], %264 {strides = array<i32>} : memref<2x2x128xf32, #tpu.memory_space<vmem>>, vector<1x2x128xf32>,
    %c1_66 = arith.constant 1 : index
    %c0_67 = arith.constant 0 : index
    %c0_68 = arith.constant 0 : index
    %265 = vector.load %arg10[%c1_66, %c0_67, %c0_68] : memref<2x2x128xf32, #tpu.memory_space<vmem>>, vector<1x2x128xf32>
    %266 = vector.shape_cast %265 : vector<1x2x128xf32> to vector<2x128xf32>
    %267 = vector.shape_cast %253 : vector<2x128xf32> to vector<1x2x128xf32>
    tpu.vector_store %arg10[%c1_66, %c0_67, %c0_68], %267 {strides = array<i32>} : memref<2x2x128xf32, #tpu.memory_space<vmem>>, vector<1x2x128xf32>,
    %c1_i32_69 = arith.constant 1 : i32
    %268 = arith.cmpi eq, %arg1, %c1_i32_69 : i32
    %269 = arith.extui %268 : i1 to i32
    %c0_i32_70 = arith.constant 0 : i32
    %270 = arith.cmpi ne, %269, %c0_i32_70 : i32
    scf.if %270 {
      %c0_71 = arith.constant 0 : index
      %c0_72 = arith.constant 0 : index
      %271 = vector.load %arg6[%c0_71, %c0_72] : memref<1x128xf32, #tpu.memory_space<vmem>>, vector<1x128xf32>
      %272 = vector.broadcast %271 : vector<1x128xf32> to vector<2x128xf32>
      %273 = arith.mulf %255, %272 : vector<2x128xf32>
      %cst_73 = arith.constant dense<0.000000e+00> : vector<2xf32>
      %274 = vector.multi_reduction <add>, %273, %cst_73 [1] : vector<2x128xf32> to vector<2xf32>
      %275 = vector.shape_cast %274 : vector<2xf32> to vector<2x1xf32>
      %c0_74 = arith.constant 0 : index
      %c0_75 = arith.constant 0 : index
      %276 = vector.load %arg7[%c0_74, %c0_75] : memref<1x1xf32, #tpu.memory_space<vmem>>, vector<1x1xf32>
      %277 = vector.broadcast %276 : vector<1x1xf32> to vector<2x1xf32>
      %278 = arith.addf %275, %277 : vector<2x1xf32>
      %c0_76 = arith.constant 0 : index
      %c0_77 = arith.constant 0 : index
      %279 = vector.load %arg8[%c0_76, %c0_77] : memref<2x1xf32, #tpu.memory_space<vmem>>, vector<2x1xf32>
      tpu.vector_store %arg8[%c0_76, %c0_77], %278 {strides = array<i32>} : memref<2x1xf32, #tpu.memory_space<vmem>>, vector<2x1xf32>,
    } else {
    }
    return
  }
  func.func @transform_0(%arg0: i32, %arg1: i32) -> (i32, i32, i32) {
    %c0_i32 = arith.constant 0 : i32
    %c0_i32_0 = arith.constant 0 : i32
    return %arg1, %arg0, %c0_i32 : i32, i32, i32
  }
  func.func @transform_1(%arg0: i32, %arg1: i32) -> (i32, i32) {
    %c0_i32 = arith.constant 0 : i32
    %c0_i32_0 = arith.constant 0 : i32
    %c0_i32_1 = arith.constant 0 : i32
    return %c0_i32, %c0_i32_0 : i32, i32
  }
  func.func @transform_2(%arg0: i32, %arg1: i32) -> (i32, i32) {
    %c0_i32 = arith.constant 0 : i32
    %c0_i32_0 = arith.constant 0 : i32
    %c0_i32_1 = arith.constant 0 : i32
    return %c0_i32, %c0_i32_0 : i32, i32
  }
  func.func @transform_3(%arg0: i32, %arg1: i32) -> (i32, i32) {
    %c0_i32 = arith.constant 0 : i32
    %c0_i32_0 = arith.constant 0 : i32
    %c0_i32_1 = arith.constant 0 : i32
    return %c0_i32, %c0_i32_0 : i32, i32
  }
  func.func @transform_4(%arg0: i32, %arg1: i32) -> (i32, i32) {
    %c0_i32 = arith.constant 0 : i32
    %c0_i32_0 = arith.constant 0 : i32
    %c0_i32_1 = arith.constant 0 : i32
    return %c0_i32, %c0_i32_0 : i32, i32
  }
  func.func @transform_5(%arg0: i32, %arg1: i32) -> (i32, i32) {
    %c0_i32 = arith.constant 0 : i32
    %c0_i32_0 = arith.constant 0 : i32
    %c0_i32_1 = arith.constant 0 : i32
    return %c0_i32, %c0_i32_0 : i32, i32
  }
  func.func @transform_6(%arg0: i32, %arg1: i32) -> (i32, i32) {
    %c0_i32 = arith.constant 0 : i32
    %c0_i32_0 = arith.constant 0 : i32
    return %arg0, %c0_i32 : i32, i32
  }
}

</mosaic_0001>

<bundles_post_ra>
// kernel: tpu_custom_call.1
= control target key start
LH: loop header
LB: loop body
LE: loop exit
PB: predicated region body
PF: predicated region fallthrough
CT: control target
= control target key end

     0   :  { %s3636_s0 = inlined_call_operand.hbm [shape: f32[8,2,512], index: 0, kind: input, shape index: {}]   ;;  %s3637_s1 = inlined_call_operand.hbm [shape: bf16[128,512], index: 1, kind: input, shape index: {}]   ;;  %s3638_s2 = inlined_call_operand.hbm [shape: bf16[256,512], index: 2, kind: input, shape index: {}]   ;;  %s3639_s3 = inlined_call_operand.vmem [shape: f32[1,512], index: 3, kind: input, shape index: {}]   ;;  %s3640_s4 = inlined_call_operand.vmem [shape: f32[1,128], index: 4, kind: input, shape index: {}]   ;;  %s3641_s5 = inlined_call_operand.<no memory space> [shape: f32[1,1], index: 5, kind: input, shape index: {}]   ;;  %s3642_s6 = inlined_call_operand.vmem [shape: f32[2,1], index: 6, kind: output, shape index: {}]  }
   0x1   :  { %v11_v0 = vstv %s3641_s5 }
   0x2   :  { %12 = vst [vmem:[#allocation4] sm:$0x1] %v11_v0 }
   0x3   :  { %13 = vsyncpa [#allocation6], 0 }
   0x4   :  { %15 = vsyncpa [#allocation6 + $0x1], 0 }
   0x5   :  { %16 = vsyncpa [#allocation8], 0  ;;  %s2824_s23 = smov 0   ;;  %s2826_s24 = smov 0  }
   0x6   :  { %s2828_s25 = smov 0   ;;  %s2830_s26 = smov 0  }
   0x7   :  { %s2832_s27 = smov 0   ;;  %s2834_s28 = smov 0  }
   0x8 LB: > { %s2038_s5 = sadd.s32 4294967295, %s2774_s28   ;;  %p56_p0 = scmp.ne.s32.totalorder %s2758_s24, %s2754_s23  ;;  %s2774_s28 = sphi %s2834_s28, %s22_s28   ;;  %s2770_s27 = sphi %s2832_s27, %s3924_s27   ;;  %s2766_s26 = sphi %s2830_s26, %s3923_s26   ;;  %s2762_s25 = sphi %s2828_s25, %s3922_s25   ;;  %s2758_s24 = sphi %s2826_s24, %s3921_s24   ;;  %s2754_s23 = sphi %s2824_s23, %s3920_s23  }
   0x9   : > { %p2854_p1 = scmp.eq.s32.totalorder %s2038_s5, 0  ;;  %p2039_p2 = scmp.ge.s32.totalorder %s2774_s28, 1 }
   0xa   : > { %p198_p3 = scmp.lt.s32.totalorder %s2774_s28, 3  ;;  %s2776_s8 = smov [#allocation7]  }
   0xb   : > { %s3761_s29 = scalar_select %p2854_p1, 1, 0 }
   0xc   : > { %p2862_p4 = por %p2854_p1, %p56_p0  ;;  %p2866_p5 = pnand %p2039_p2, %p198_p3 }
   0xd   : > { %s210_s9 = sshll.u32 %s2776_s8, 4  ;;  %s2777_s11 = smov [#allocation9]   ;;  %s211_s9 = int_to_ptr.vmem [resolvable:$true] %s210_s9 }
   0xe   : > { %s3762_s30 = scalar_select %p2862_p4, 1, 0 }
   0xf   : > { %s3763_s7 = scalar_select %p2866_p5, 1, 0 }
  0x10   : > { %p2193_p6 = pneg %p2866_p5  ;;  %s223_s12 = sshll.u32 %s2777_s11, 4  ;;  %s2878_s12 = int_to_ptr.vmem [resolvable:$true] %s223_s12 }
  0x11   : > { %s2634_s15 = scalar_lea.hbm %s3637_s1, 4096 }
  0x12   : > { %p2874_p7 = pnand %p2193_p6, %p2854_p1  ;;  %p2635_p8 = scmp.ne.s32.totalorder %s3637_s1, %s2634_s15 }
  0x13   : > { %p2641_p12 = scmp.lt.u32.totalorder %s2634_s15, %s3637_s1 }
  0x14   : > { %p2636_p9 = pneg %p2874_p7 }
  0x16   : > { %p2637_p10 = pnand %p2636_p9, %p2635_p8 }
  0x18   : > { %p2638_p11 = pneg %p2637_p10 }
  0x1a   : > { %p2643_p13 = pnand %p2641_p12, %p2638_p11 }
  0x1c   : > { %2646 = shalt.err (!%p2643_p13)
}
  0x1d   : > { %s2647_s20 = scalar_lea.vmem %s211_s9, 4096  ;;  %p2655_p6 = scmp.lt.s32.totalorder %s211_s9, %s211_s9 }
  0x1e   : > { %p2648_p0 = scmp.ne.s32.totalorder %s211_s9, %s2647_s20  ;;  %p2656_p1 = scmp.lt.s32.totalorder %s2647_s20, %s2647_s20 }
  0x20   : > { %p2650_p2 = pnand %p2648_p0, %p2636_p9  ;;  %p2657_p4 = por %p2656_p1, %p2655_p6 }
  0x22   : > { %p2651_p3 = pneg %p2650_p2 }
  0x24   : > { %p2658_p5 = pnand %p2657_p4, %p2651_p3 }
  0x26   : > { %2661 = shalt.err (!%p2658_p5)
}
  0x27   : > { %s2778_s21 = smov 256   ;;  %s2779_s22 = smov 16  }
  0x28   : > { %2196 = dma.hbm_to_vmem [thread:$0]  (!%p2874_p7), %s3637_s1, 4096, %s211_s9, [#allocation8], %s2778_s21, %s2778_s21, %s2779_s22  }
  0x29   : > { %s2662_s13 = scalar_lea.hbm %s3638_s2, 8192 }
  0x2a   : > { %p2663_p8 = scmp.ne.s32.totalorder %s3638_s2, %s2662_s13  ;;  %p2669_p5 = scmp.lt.u32.totalorder %s2662_s13, %s3638_s2 }
  0x2c   : > { %p2665_p1 = pnand %p2663_p8, %p2636_p9 }
  0x2e   : > { %p2666_p4 = pneg %p2665_p1 }
  0x30   : > { %p2671_p10 = pnand %p2669_p5, %p2666_p4 }
  0x32   : > { %2674 = shalt.err (!%p2671_p10)
}
  0x33   : > { %s2675_s9 = scalar_lea.vmem %s2878_s12, 8192  ;;  %p2683_p0 = scmp.lt.s32.totalorder %s2878_s12, %s2878_s12 }
  0x34   : > { %p2676_p11 = scmp.ne.s32.totalorder %s2878_s12, %s2675_s9  ;;  %p2684_p2 = scmp.lt.s32.totalorder %s2675_s9, %s2675_s9 }
  0x36   : > { %p2678_p12 = pnand %p2676_p11, %p2636_p9  ;;  %p2685_p3 = por %p2684_p2, %p2683_p0 }
  0x38   : > { %p2679_p13 = pneg %p2678_p12 }
  0x3a   : > { %p2686_p6 = pnand %p2685_p3, %p2679_p13 }
  0x3c   : > { %2689 = shalt.err (!%p2686_p6)
}
  0x3d   : > { %2199 = dma.hbm_to_vmem [thread:$0]  (!%p2874_p7), %s3638_s2, 8192, %s2878_s12, [#allocation8], %s2778_s21, %s2778_s21, %s2779_s22  }
  0x3e   : > { %s31_s20 = sadd.s32 1, %s2770_s27  ;;  %s43_s23 = sadd.s32 1, %s2762_s25 }
  0x3f   : > { %p32_p9 = scmp.ge.s32.totalorder %s31_s20, 2  ;;  %p50_p8 = scmp.ne.s32.totalorder %s2762_s25, %s2758_s24 }
  0x40   : > { %p51_p1 = scmp.eq.s32.totalorder %s2774_s28, 0  ;;  %p2206_p4 = scmp.lt.s32.totalorder %s2774_s28, 2 }
  0x41   : > { %s3926_s20 = smov (%p32_p9, %s31_s20), 0  ;;  %s246_s10 = sand.u32 1, %s2762_s25  }
  0x42   : > { %p52_p5 = por %p51_p1, %p50_p8  ;;  %s38_s5 = ssub.s32 %s2770_s27, %s3926_s20 }
  0x43   : > { %p41_p10 = scmp.eq.s32.totalorder %s38_s5, 0  ;;  %s2043_s8 = sshll.u32 %s246_s10, 5 }
  0x44   : > { %s2182_s11 = sshll.u32 %s2770_s27, 9  ;;  %s250_s22 = scalar_lea.vmem [#allocation5], %s2043_s8 }
  0x45   : > { %s2940_s13 = scalar_select %p41_p10, %s2762_s25, %s43_s23  }
  0x46   : > { %s2945_s21 = scalar_lea.hbm %s3636_s0, %s2182_s11  ;;  %s260_s15 = sshll.u32 %s250_s22, 4  ;;  %s2947_s15 = int_to_ptr.vmem [resolvable:$true] %s260_s15 }
  0x47   : > { %p2951_p7 = pnand %p2206_p4, %p52_p5  ;;  %s2955_s17 = scalar_lea.sflag [#allocation6], %s246_s10 }
  0x48   : > { %s2690_s9 = scalar_lea.hbm %s2945_s21, 512  ;;  %s2695_s23 = scalar_lea.hbm %s3636_s0, 1024 }
  0x49   : > { %p2691_p11 = scmp.ne.s32.totalorder %s2945_s21, %s2690_s9  ;;  %p2692_p12 = pneg %p2951_p7 }
  0x4a   : > { %p2696_p2 = scmp.lt.u32.totalorder %s2945_s21, %s3636_s0  ;;  %p2697_p3 = scmp.lt.u32.totalorder %s2695_s23, %s2690_s9 }
  0x4b   : > { %p2693_p13 = pnand %p2692_p12, %p2691_p11  ;;  %p2699_p9 = scmp.lt.u32.totalorder %s2690_s9, %s2945_s21 }
  0x4c   : > { %p2698_p6 = por %p2697_p3, %p2696_p2 }
  0x4d   : > { %p2694_p0 = pneg %p2693_p13 }
  0x4e   : > { %p2700_p8 = por %p2699_p9, %p2698_p6 }
  0x50   : > { %p2701_p1 = pnand %p2700_p8, %p2694_p0 }
  0x52   : > { %2704 = shalt.err (!%p2701_p1)
}
  0x53   : > { %s2705_s10 = scalar_lea.vmem %s2947_s15, 512  ;;  %s2780_s11 = smov [#allocation5]  }
  0x54   : > { %p2706_p4 = scmp.ne.s32.totalorder %s2947_s15, %s2705_s10  ;;  %s2710_s14 = sshll.u32 %s2780_s11, 4  ;;  %s2711_s14 = int_to_ptr.vmem [resolvable:$false] %s2710_s14 }
  0x55   : > { %s2712_s12 = scalar_lea.vmem %s2711_s14, 1024  ;;  %p2713_p11 = scmp.lt.s32.totalorder %s2947_s15, %s2711_s14 }
  0x56   : > { %p2708_p5 = pnand %p2706_p4, %p2692_p12  ;;  %p2714_p13 = scmp.lt.s32.totalorder %s2712_s12, %s2705_s10 }
  0x58   : > { %p2709_p10 = pneg %p2708_p5  ;;  %p2715_p2 = por %p2714_p13, %p2713_p11 }
  0x5a   : > { %p2716_p3 = pnand %p2715_p2, %p2709_p10 }
  0x5c   : > { %2719 = shalt.err (!%p2716_p3)
}
  0x5d   : > { %s2781_s22 = smov 128   ;;  %s2782_s9 = smov 8  }
  0x5e   : > { %2203 = dma.hbm_to_vmem [thread:$0]  (!%p2951_p7), %s2945_s21, 512, %s2947_s15, %s2955_s17, %s2781_s22, %s2781_s22, %s2782_s9  }
  0x5f   : > { %p3766_p12 = scmp.ne.s32.totalorder %s3763_s7, 0 }
  0x61   : > { %272 = sbr.rel (%p3766_p12) target bundleno = 1728 (0x6c0), region = 44 }
  0x68   : > { %s274_s18 = sand.u32 1, %s2758_s24   ;;  %p3767_p0 = scmp.ne.s32.totalorder %s3762_s30, 0 }
  0x69   : > { %s2048_s19 = sshll.u32 %s274_s18, 5  ;;  %s275_s23 = scalar_lea.sflag [#allocation6], %s274_s18 }
  0x6a   : > { %s2986_s5 = scalar_lea.vmem [#allocation5], %s2048_s19 }
  0x6b   : > { %2745 = dma.done.wait (%p3767_p0), %s275_s23, 512  }
  0x6c   : > { %2747 = vsyncadd (%p3767_p0), %s275_s23, 4294966784  ;;  %p3768_p6 = scmp.ne.s32.totalorder %s3761_s29, 0 }
  0x6e   : > { %2749 = dma.done.wait (%p3768_p6), [#allocation8], 12288  }
  0x6f   : > { %2751 = vsyncadd (%p3768_p6), [#allocation8], 4294955008  ;;  %p2051_p7 = scmp.ne.s32.totalorder %s2766_s26, 0 }
  0x70   : > { %v2783_v1 = vmov (!%p2051_p7), 0.0  }
  0x71   : > { %323 = sbr.rel (%p2051_p7) target bundleno = 120 (0x78), region = 60  ;;  %324 = vst [vmem:[#allocation2] sm:$0x3] (!%p2051_p7), %v2783_v1  ;;  %325 = vst [vmem:[#allocation2 + $0x2] sm:$0x3] (!%p2051_p7), %v2783_v1 }
  0x72   : > { %326 = vst [vmem:[#allocation3] sm:$0x3] (!%p2051_p7), %v2783_v1  ;;  %327 = vst [vmem:[#allocation3 + $0x2] sm:$0x3] (!%p2051_p7), %v2783_v1 }
  0x78 PF: > { %v2997_v2 = vld [vmem:[#allocation7 + $0x4] ss:$16 sps:$4 sm:$0xff]   ;;  %v2999_v3 = vld [vmem:[#allocation7 + $0xc] ss:$16 sps:$4 sm:$0xff]   ;;  %v3647_v4 = vmov 0   ;;  %p2175_p9 = scmp.ne.s32.totalorder %s2766_s26, 1 }
  0x79   : > { %3769 = vst [vmem:[#allocation12_spill] sm:$0xff] %v2997_v2  ;;  %3770 = vst [vmem:[#allocation13_spill] sm:$0xff] %v2999_v3  ;;  %646 = vmatprep.mubr.bf16.mxu0 %v3647_v4  ;;  %687 = vmatprep.mubr.bf16.mxu1 %v3647_v4  ;;  %v3004_v5 = vld [vmem:[#allocation7] ss:$16 sps:$4 sm:$0xff]   ;;  %v3006_v6 = vld [vmem:[#allocation7 + $0x8] ss:$16 sps:$4 sm:$0xff]  }
  0x7a   : > { %614 = vmatprep.subr.bf16.mxu0 %v2997_v2  ;;  %655 = vmatprep.subr.bf16.mxu1 %v2999_v3  ;;  %v3009_v7 = vld [vmem:[#allocation7 + $0x24] ss:$16 sps:$4 sm:$0xff]   ;;  %v3013_v8 = vld [vmem:[#allocation7 + $0x2c] ss:$16 sps:$4 sm:$0xff]   ;;  %v3015_v9 = vld [vmem:[#allocation7 + $0x20] ss:$16 sps:$4 sm:$0xff]  }
  0x7b   : > { %615 = vmatpush1.bf16.msra.mxu0 %v3004_v5  ;;  %656 = vmatpush1.bf16.msra.mxu1 %v3006_v6  ;;  %v3018_v10 = vld [vmem:[#allocation7 + $0x28] ss:$16 sps:$4 sm:$0xff]   ;;  %v3021_v11 = vld [vmem:[#allocation7 + $0x44] ss:$16 sps:$4 sm:$0xff]   ;;  %v3023_v12 = vld [vmem:[#allocation7 + $0x4c] ss:$16 sps:$4 sm:$0xff]  }
  0x7c   : > { %616 = vmatprep.subr.bf16.mxu0 %v3009_v7  ;;  %657 = vmatprep.subr.bf16.mxu1 %v3013_v8  ;;  %v3025_v13 = vld [vmem:[#allocation7 + $0x40] ss:$16 sps:$4 sm:$0xff]   ;;  %v3027_v14 = vld [vmem:[#allocation7 + $0x48] ss:$16 sps:$4 sm:$0xff]   ;;  %v3031_v15 = vld [vmem:[#allocation7 + $0x64] ss:$16 sps:$4 sm:$0xff]  }
  0x7d   : > { %v3035_v16 = vld [vmem:[#allocation7 + $0x6c] ss:$16 sps:$4 sm:$0xff]   ;;  %v3037_v17 = vld [vmem:[#allocation7 + $0x60] ss:$16 sps:$4 sm:$0xff]   ;;  %v3041_v18 = vld [vmem:[#allocation7 + $0x68] ss:$16 sps:$4 sm:$0xff]  }
  0x7e   : > { %v3043_v19 = vld [vmem:[#allocation7 + $0x84] ss:$16 sps:$4 sm:$0xff]   ;;  %v3047_v20 = vld [vmem:[#allocation7 + $0x8c] ss:$16 sps:$4 sm:$0xff]   ;;  %v3049_v21 = vld [vmem:[#allocation7 + $0x80] ss:$16 sps:$4 sm:$0xff]  }
  0x7f   : > { %617 = vmatpush1.bf16.msra.mxu0 %v3015_v9  ;;  %658 = vmatpush1.bf16.msra.mxu1 %v3018_v10  ;;  %v3051_v22 = vld [vmem:[#allocation7 + $0x88] ss:$16 sps:$4 sm:$0xff]   ;;  %v3055_v23 = vld [vmem:[#allocation7 + $0xa4] ss:$16 sps:$4 sm:$0xff]   ;;  %v3059_v24 = vld [vmem:[#allocation7 + $0xac] ss:$16 sps:$4 sm:$0xff]  }
  0x80   : > { %618 = vmatprep.subr.bf16.mxu0 %v3021_v11  ;;  %659 = vmatprep.subr.bf16.mxu1 %v3023_v12  ;;  %v3063_v25 = vld [vmem:[#allocation7 + $0xa0] ss:$16 sps:$4 sm:$0xff]   ;;  %v3065_v26 = vld [vmem:[#allocation7 + $0xa8] ss:$16 sps:$4 sm:$0xff]   ;;  %v3069_v27 = vld [vmem:[#allocation7 + $0xc4] ss:$16 sps:$4 sm:$0xff]  }
  0x81   : > { %v3071_v28 = vld [vmem:[#allocation7 + $0xcc] ss:$16 sps:$4 sm:$0xff]   ;;  %v3073_v29 = vld [vmem:[#allocation7 + $0xc0] ss:$16 sps:$4 sm:$0xff]   ;;  %v3075_v30 = vld [vmem:[#allocation7 + $0xc8] ss:$16 sps:$4 sm:$0xff]  }
  0x82   : > { %v3079_v31 = vld [vmem:[#allocation7 + $0xe4] ss:$16 sps:$4 sm:$0xff]   ;;  %v3083_v32 = vld [vmem:[#allocation7 + $0xec] ss:$16 sps:$4 sm:$0xff]   ;;  %v3085_v33 = vld [vmem:[#allocation7 + $0xe0] ss:$16 sps:$4 sm:$0xff]  }
  0x83   : > { %619 = vmatpush1.bf16.msra.mxu0 %v3025_v13  ;;  %660 = vmatpush1.bf16.msra.mxu1 %v3027_v14  ;;  %v3087_v34 = vld [vmem:[#allocation7 + $0xe8] ss:$16 sps:$4 sm:$0xff]   ;;  %v3089_v36 = vld [vmem:[#allocation9 + $0x4] ss:$16 sps:$4 sm:$0xff]   ;;  %v3091_v37 = vld [vmem:[#allocation9 + $0xc] ss:$16 sps:$4 sm:$0xff]  }
  0x84   : > { %620 = vmatprep.subr.bf16.mxu0 %v3031_v15  ;;  %661 = vmatprep.subr.bf16.mxu1 %v3035_v16  ;;  %v446_v35 = vld [vmem:[#allocation2] sm:$0x3]  ;;  %v3097_v38 = vld [vmem:[#allocation9] ss:$16 sps:$4 sm:$0xff]   ;;  %v3103_v42 = vld [vmem:[#allocation9 + $0x2c] ss:$16 sps:$4 sm:$0xff]  }
  0x85   : > { %v3099_v39 = vld [vmem:[#allocation9 + $0x8] ss:$16 sps:$4 sm:$0xff]   ;;  %v453_v40 = vpack.c.bf16 %v446_v35, %v446_v35  ;;  %v3101_v41 = vld [vmem:[#allocation9 + $0x24] ss:$16 sps:$4 sm:$0xff]   ;;  %v3109_v43 = vld [vmem:[#allocation9 + $0x20] ss:$16 sps:$4 sm:$0xff]  }
  0x86   : > { %v3111_v44 = vld [vmem:[#allocation9 + $0x28] ss:$16 sps:$4 sm:$0xff]   ;;  %v3119_v45 = vld [vmem:[#allocation9 + $0x44] ss:$16 sps:$4 sm:$0xff]   ;;  %v3121_v46 = vld [vmem:[#allocation9 + $0x4c] ss:$16 sps:$4 sm:$0xff]  }
  0x87   : > { %621 = vmatpush1.bf16.msra.mxu0 %v3037_v17  ;;  %662 = vmatpush1.bf16.msra.mxu1 %v3041_v18  ;;  %v3125_v47 = vld [vmem:[#allocation9 + $0x40] ss:$16 sps:$4 sm:$0xff]   ;;  %v3127_v48 = vld [vmem:[#allocation9 + $0x48] ss:$16 sps:$4 sm:$0xff]   ;;  %v3131_v49 = vld [vmem:[#allocation9 + $0x64] ss:$16 sps:$4 sm:$0xff]  }
  0x88   : > { %622 = vmatprep.subr.bf16.mxu0 %v3043_v19  ;;  %663 = vmatprep.subr.bf16.mxu1 %v3047_v20  ;;  %v3133_v50 = vld [vmem:[#allocation9 + $0x6c] ss:$16 sps:$4 sm:$0xff]   ;;  %v3135_v51 = vld [vmem:[#allocation9 + $0x60] ss:$16 sps:$4 sm:$0xff]   ;;  %v3137_v52 = vld [vmem:[#allocation9 + $0x68] ss:$16 sps:$4 sm:$0xff]  }
  0x89   : > { %3771 = vst [vmem:[#allocation14_spill] sm:$0xff] %v3133_v50  ;;  %3772 = vst [vmem:[#allocation15_spill] sm:$0xff] %v3135_v51  ;;  %v3143_v53 = vld [vmem:[#allocation9 + $0x84] ss:$16 sps:$4 sm:$0xff]   ;;  %v3145_v54 = vld [vmem:[#allocation9 + $0x8c] ss:$16 sps:$4 sm:$0xff]  }
  0x8a   : > { %3773 = vst [vmem:[#allocation16_spill] sm:$0xff] %v3137_v52  ;;  %3774 = vst [vmem:[#allocation17_spill] sm:$0xff] %v3143_v53  ;;  %v3147_v55 = vld [vmem:[#allocation9 + $0x80] ss:$16 sps:$4 sm:$0xff]   ;;  %v3149_v56 = vld [vmem:[#allocation9 + $0x88] ss:$16 sps:$4 sm:$0xff]  }
  0x8b   : > { %623 = vmatpush1.bf16.msra.mxu0 %v3049_v21  ;;  %664 = vmatpush1.bf16.msra.mxu1 %v3051_v22  ;;  %3775 = vst [vmem:[#allocation18_spill] sm:$0xff] %v3145_v54  ;;  %3776 = vst [vmem:[#allocation19_spill] sm:$0xff] %v3147_v55  ;;  %v3155_v57 = vld [vmem:[#allocation9 + $0xa4] ss:$16 sps:$4 sm:$0xff]   ;;  %v3157_v58 = vld [vmem:[#allocation9 + $0xac] ss:$16 sps:$4 sm:$0xff]  }
  0x8c   : > { %624 = vmatprep.subr.bf16.mxu0 %v3055_v23  ;;  %665 = vmatprep.subr.bf16.mxu1 %v3059_v24  ;;  %3777 = vst [vmem:[#allocation20_spill] sm:$0xff] %v3149_v56  ;;  %3778 = vst [vmem:[#allocation21_spill] sm:$0xff] %v3155_v57  ;;  %v3159_v59 = vld [vmem:[#allocation9 + $0xa0] ss:$16 sps:$4 sm:$0xff]   ;;  %v3161_v60 = vld [vmem:[#allocation9 + $0xa8] ss:$16 sps:$4 sm:$0xff]  }
  0x8d   : > { %3779 = vst [vmem:[#allocation22_spill] sm:$0xff] %v3157_v58  ;;  %3780 = vst [vmem:[#allocation23_spill] sm:$0xff] %v3159_v59  ;;  %v3167_v61 = vld [vmem:[#allocation9 + $0xc4] ss:$16 sps:$4 sm:$0xff]   ;;  %v3169_v62 = vld [vmem:[#allocation9 + $0xcc] ss:$16 sps:$4 sm:$0xff]  }
  0x8e   : > { %3781 = vst [vmem:[#allocation24_spill] sm:$0xff] %v3161_v60  ;;  %3782 = vst [vmem:[#allocation25_spill] sm:$0xff] %v3167_v61  ;;  %v3171_v63 = vld [vmem:[#allocation9 + $0xc0] ss:$16 sps:$4 sm:$0xff]   ;;  %v3173_v0 = vld [vmem:[#allocation9 + $0xc8] ss:$16 sps:$4 sm:$0xff]  }
  0x8f   : > { %625 = vmatpush1.bf16.msra.mxu0 %v3063_v25  ;;  %666 = vmatpush1.bf16.msra.mxu1 %v3065_v26  ;;  %3783 = vst [vmem:[#allocation26_spill] sm:$0xff] %v3169_v62  ;;  %3784 = vst [vmem:[#allocation27_spill] sm:$0xff] %v3171_v63  ;;  %v3179_v1 = vld [vmem:[#allocation9 + $0xe4] ss:$16 sps:$4 sm:$0xff]   ;;  %v3181_v35 = vld [vmem:[#allocation9 + $0xec] ss:$16 sps:$4 sm:$0xff]  }
  0x90   : > { %626 = vmatprep.subr.bf16.mxu0 %v3069_v27  ;;  %667 = vmatprep.subr.bf16.mxu1 %v3071_v28  ;;  %3785 = vst [vmem:[#allocation28_spill] sm:$0xff] %v3173_v0  ;;  %3786 = vst [vmem:[#allocation29_spill] sm:$0xff] %v3179_v1  ;;  %v3185_v4 = vld [vmem:[#allocation9 + $0xe8] ss:$16 sps:$4 sm:$0xff]   ;;  %vm1932_vm0 = vcmask (!%p2175_p9), 1041408   ;;  %vm1944_vm1 = vcmask (!%p2175_p9), 1024  }
  0x91   : > { %3787 = vst [vmem:[#allocation30_spill] sm:$0xff] %v3181_v35  ;;  %3789 = vst [vmem:[#allocation32_spill] sm:$0xff] %v3185_v4 }
  0x93   : > { %627 = vmatpush1.bf16.msra.mxu0 %v3073_v29  ;;  %668 = vmatpush1.bf16.msra.mxu1 %v3075_v30 }
  0x94   : > { %628 = vmatprep.subr.bf16.mxu0 %v3079_v31  ;;  %669 = vmatprep.subr.bf16.mxu1 %v3083_v32 }
  0x97   : > { %629 = vmatpush1.bf16.msra.mxu0 %v3085_v33  ;;  %670 = vmatpush1.bf16.msra.mxu1 %v3087_v34 }
  0x98   : > { %1072 = vmatprep.subr.bf16.mxu0 %v3089_v36  ;;  %1113 = vmatprep.subr.bf16.mxu1 %v3091_v37 }
  0x9a   : > { %647 = vmatmul.mubr.bf16.vlgmr.msra.gmra.mrb[0].mxu0 %v453_v40  ;;  %688 = vmatmul.mubr.bf16.vlgmr.msra.gmra.mrb[0].mxu1 %v453_v40  ;;  %v3183_v40 = vld [vmem:[#allocation9 + $0xe0] ss:$16 sps:$4 sm:$0xff]  }
  0x9b   : > { %1073 = vmatpush1.bf16.msra.mxu0 %v3097_v38  ;;  %1114 = vmatpush1.bf16.msra.mxu1 %v3099_v39  ;;  %3788 = vst [vmem:[#allocation31_spill] sm:$0xff] %v3183_v40 }
  0x9c   : > { %1074 = vmatprep.subr.bf16.mxu0 %v3101_v41  ;;  %1115 = vmatprep.subr.bf16.mxu1 %v3103_v42 }
  0x9f   : > { %1075 = vmatpush1.bf16.msra.mxu0 %v3109_v43  ;;  %1116 = vmatpush1.bf16.msra.mxu1 %v3111_v44 }
  0xa0   : > { %1076 = vmatprep.subr.bf16.mxu0 %v3119_v45  ;;  %1117 = vmatprep.subr.bf16.mxu1 %v3121_v46 }
  0xa3   : > { %1077 = vmatpush1.bf16.msra.mxu0 %v3125_v47  ;;  %1118 = vmatpush1.bf16.msra.mxu1 %v3127_v48 }
  0xa4   : > { %1078 = vmatprep.subr.bf16.mxu0 %v3131_v49  ;;  %1119 = vmatprep.subr.bf16.mxu1 %v3133_v50 }
  0xa7   : > { %1079 = vmatpush1.bf16.msra.mxu0 %v3135_v51  ;;  %1120 = vmatpush1.bf16.msra.mxu1 %v3137_v52 }
  0xa8   : > { %1080 = vmatprep.subr.bf16.mxu0 %v3143_v53  ;;  %1121 = vmatprep.subr.bf16.mxu1 %v3145_v54 }
  0xab   : > { %1081 = vmatpush1.bf16.msra.mxu0 %v3147_v55  ;;  %1122 = vmatpush1.bf16.msra.mxu1 %v3149_v56 }
  0xac   : > { %1082 = vmatprep.subr.bf16.mxu0 %v3155_v57  ;;  %1123 = vmatprep.subr.bf16.mxu1 %v3157_v58 }
  0xaf   : > { %1083 = vmatpush1.bf16.msra.mxu0 %v3159_v59  ;;  %1124 = vmatpush1.bf16.msra.mxu1 %v3161_v60  ;;  %v3211_v60 = vld [vmem:[#allocation9 + $0x144] ss:$16 sps:$4 sm:$0xff]   ;;  %v3227_v59 = vld [vmem:[#allocation9 + $0x16c] ss:$16 sps:$4 sm:$0xff]  }
  0xb0   : > { %1084 = vmatprep.subr.bf16.mxu0 %v3167_v61  ;;  %1125 = vmatprep.subr.bf16.mxu1 %v3169_v62  ;;  %v3191_v62 = vld [vmem:[#allocation9 + $0x104] ss:$16 sps:$4 sm:$0xff]   ;;  %v3197_v61 = vld [vmem:[#allocation9 + $0x108] ss:$16 sps:$4 sm:$0xff]   ;;  %3798 = vst [vmem:[#allocation41_spill] sm:$0xff] %v3211_v60  ;;  %3803 = vst [vmem:[#allocation46_spill] sm:$0xff] %v3227_v59 }
  0xb1   : > { %3790 = vst [vmem:[#allocation33_spill] sm:$0xff] %v3191_v62  ;;  %3793 = vst [vmem:[#allocation36_spill] sm:$0xff] %v3197_v61 }
  0xb3   : > { %1085 = vmatpush1.bf16.msra.mxu0 %v3171_v63  ;;  %1126 = vmatpush1.bf16.msra.mxu1 %v3173_v0  ;;  %v3193_v63 = vld [vmem:[#allocation9 + $0x10c] ss:$16 sps:$4 sm:$0xff]   ;;  %v3195_v0 = vld [vmem:[#allocation9 + $0x100] ss:$16 sps:$4 sm:$0xff]  }
  0xb4   : > { %1086 = vmatprep.subr.bf16.mxu0 %v3179_v1  ;;  %1127 = vmatprep.subr.bf16.mxu1 %v3181_v35  ;;  %3791 = vst [vmem:[#allocation34_spill] sm:$0xff] %v3193_v63  ;;  %3792 = vst [vmem:[#allocation35_spill] sm:$0xff] %v3195_v0  ;;  %v3203_v35 = vld [vmem:[#allocation9 + $0x124] ss:$16 sps:$4 sm:$0xff]   ;;  %v3209_v1 = vld [vmem:[#allocation9 + $0x128] ss:$16 sps:$4 sm:$0xff]  }
  0xb5   : > { %3794 = vst [vmem:[#allocation37_spill] sm:$0xff] %v3203_v35  ;;  %3797 = vst [vmem:[#allocation40_spill] sm:$0xff] %v3209_v1 }
  0xb7   : > { %1087 = vmatpush1.bf16.msra.mxu0 %v3183_v40  ;;  %1128 = vmatpush1.bf16.msra.mxu1 %v3185_v4  ;;  %v3205_v40 = vld [vmem:[#allocation9 + $0x12c] ss:$16 sps:$4 sm:$0xff]   ;;  %v3207_v4 = vld [vmem:[#allocation9 + $0x120] ss:$16 sps:$4 sm:$0xff]  }
  0xb8   : > { %1088 = vmatprep.subr.bf16.mxu0 %v3191_v62  ;;  %1129 = vmatprep.subr.bf16.mxu1 %v3193_v63  ;;  %3795 = vst [vmem:[#allocation38_spill] sm:$0xff] %v3205_v40  ;;  %3796 = vst [vmem:[#allocation39_spill] sm:$0xff] %v3207_v4  ;;  %v3215_v62 = vld [vmem:[#allocation9 + $0x14c] ss:$16 sps:$4 sm:$0xff]   ;;  %v3225_v63 = vld [vmem:[#allocation9 + $0x164] ss:$16 sps:$4 sm:$0xff]  }
  0xb9   : > { %3799 = vst [vmem:[#allocation42_spill] sm:$0xff] %v3215_v62  ;;  %3802 = vst [vmem:[#allocation45_spill] sm:$0xff] %v3225_v63 }
  0xbb   : > { %1089 = vmatpush1.bf16.msra.mxu0 %v3195_v0  ;;  %1130 = vmatpush1.bf16.msra.mxu1 %v3197_v61  ;;  %v3219_v61 = vld [vmem:[#allocation9 + $0x140] ss:$16 sps:$4 sm:$0xff]   ;;  %v3221_v0 = vld [vmem:[#allocation9 + $0x148] ss:$16 sps:$4 sm:$0xff]  }
  0xbc   : > { %1090 = vmatprep.subr.bf16.mxu0 %v3203_v35  ;;  %1131 = vmatprep.subr.bf16.mxu1 %v3205_v40  ;;  %3800 = vst [vmem:[#allocation43_spill] sm:$0xff] %v3219_v61  ;;  %3801 = vst [vmem:[#allocation44_spill] sm:$0xff] %v3221_v0  ;;  %v3231_v40 = vld [vmem:[#allocation9 + $0x160] ss:$16 sps:$4 sm:$0xff]  }
  0xbd   : > { %3804 = vst [vmem:[#allocation47_spill] sm:$0xff] %v3231_v40 }
  0xbf   : > { %1091 = vmatpush1.bf16.msra.mxu0 %v3207_v4  ;;  %1132 = vmatpush1.bf16.msra.mxu1 %v3209_v1  ;;  %v3233_v4 = vld [vmem:[#allocation9 + $0x168] ss:$16 sps:$4 sm:$0xff]   ;;  %v3237_v1 = vld [vmem:[#allocation9 + $0x184] ss:$16 sps:$4 sm:$0xff]  }
  0xc0   : > { %1092 = vmatprep.subr.bf16.mxu0 %v3211_v60  ;;  %1133 = vmatprep.subr.bf16.mxu1 %v3215_v62  ;;  %3805 = vst [vmem:[#allocation48_spill] sm:$0xff] %v3233_v4  ;;  %3806 = vst [vmem:[#allocation49_spill] sm:$0xff] %v3237_v1  ;;  %v3239_v60 = vld [vmem:[#allocation9 + $0x18c] ss:$16 sps:$4 sm:$0xff]   ;;  %v448_v62 = vld [vmem:[#allocation2 + $0x2] sm:$0x3] }
  0xc1   : > { %3807 = vst [vmem:[#allocation50_spill] sm:$0xff] %v3239_v60  ;;  %v751_v35 = vpack.c.bf16 %v448_v62, %v448_v62  ;;  %v3255_v62 = vld [vmem:[#allocation9 + $0x1a0] ss:$16 sps:$4 sm:$0xff]  }
  0xc2   : > { %3812 = vst [vmem:[#allocation55_spill] sm:$0xff] %v3255_v62 }
  0xc3   : > { %1093 = vmatpush1.bf16.msra.mxu0 %v3219_v61  ;;  %1134 = vmatpush1.bf16.msra.mxu1 %v3221_v0  ;;  %v3243_v61 = vld [vmem:[#allocation9 + $0x180] ss:$16 sps:$4 sm:$0xff]   ;;  %v3245_v0 = vld [vmem:[#allocation9 + $0x188] ss:$16 sps:$4 sm:$0xff]  }
  0xc4   : > { %1094 = vmatprep.subr.bf16.mxu0 %v3225_v63  ;;  %1135 = vmatprep.subr.bf16.mxu1 %v3227_v59  ;;  %3808 = vst [vmem:[#allocation51_spill] sm:$0xff] %v3243_v61  ;;  %3809 = vst [vmem:[#allocation52_spill] sm:$0xff] %v3245_v0  ;;  %v3249_v63 = vld [vmem:[#allocation9 + $0x1a4] ss:$16 sps:$4 sm:$0xff]   ;;  %v3251_v59 = vld [vmem:[#allocation9 + $0x1ac] ss:$16 sps:$4 sm:$0xff]  }
  0xc5   : > { %3810 = vst [vmem:[#allocation53_spill] sm:$0xff] %v3249_v63  ;;  %3811 = vst [vmem:[#allocation54_spill] sm:$0xff] %v3251_v59  ;;  %1104 = vmatprep.mubr.bf16.mxu0 %v751_v35  ;;  %1145 = vmatprep.mubr.bf16.mxu1 %v751_v35  ;;  %v3267_v35 = vld [vmem:[#allocation9 + $0x1c0] ss:$16 sps:$4 sm:$0xff]  }
  0xc6   : > { %3816 = vst [vmem:[#allocation59_spill] sm:$0xff] %v3267_v35 }
  0xc7   : > { %1095 = vmatpush1.bf16.msra.mxu0 %v3231_v40  ;;  %1136 = vmatpush1.bf16.msra.mxu1 %v3233_v4  ;;  %v3257_v4 = vld [vmem:[#allocation9 + $0x1a8] ss:$16 sps:$4 sm:$0xff]  }
  0xc8   : > { %1096 = vmatprep.subr.bf16.mxu0 %v3237_v1  ;;  %1137 = vmatprep.subr.bf16.mxu1 %v3239_v60  ;;  %3813 = vst [vmem:[#allocation56_spill] sm:$0xff] %v3257_v4  ;;  %v3261_v1 = vld [vmem:[#allocation9 + $0x1c4] ss:$16 sps:$4 sm:$0xff]   ;;  %v3263_v60 = vld [vmem:[#allocation9 + $0x1cc] ss:$16 sps:$4 sm:$0xff]  }
  0xc9   : > { %3814 = vst [vmem:[#allocation57_spill] sm:$0xff] %v3261_v1  ;;  %3815 = vst [vmem:[#allocation58_spill] sm:$0xff] %v3263_v60 }
  0xcb   : > { %1097 = vmatpush1.bf16.msra.mxu0 %v3243_v61  ;;  %1138 = vmatpush1.bf16.msra.mxu1 %v3245_v0  ;;  %v3269_v61 = vld [vmem:[#allocation9 + $0x1c8] ss:$16 sps:$4 sm:$0xff]   ;;  %v3273_v0 = vld [vmem:[#allocation9 + $0x1e4] ss:$16 sps:$4 sm:$0xff]  }
  0xcc   : > { %1098 = vmatprep.subr.bf16.mxu0 %v3249_v63  ;;  %1139 = vmatprep.subr.bf16.mxu1 %v3251_v59  ;;  %3817 = vst [vmem:[#allocation60_spill] sm:$0xff] %v3269_v61  ;;  %3818 = vst [vmem:[#allocation61_spill] sm:$0xff] %v3273_v0  ;;  %v3275_v63 = vld [vmem:[#allocation9 + $0x1ec] ss:$16 sps:$4 sm:$0xff]   ;;  %v3279_v59 = vld [vmem:[#allocation9 + $0x1e0] ss:$16 sps:$4 sm:$0xff]  }
  0xcd   : > { %3819 = vst [vmem:[#allocation62_spill] sm:$0xff] %v3275_v63  ;;  %3820 = vst [vmem:[#allocation63_spill] sm:$0xff] %v3279_v59 }
  0xcf   : > { %1099 = vmatpush1.bf16.msra.mxu0 %v3255_v62  ;;  %1140 = vmatpush1.bf16.msra.mxu1 %v3257_v4  ;;  %v3281_v62 = vld [vmem:[#allocation9 + $0x1e8] ss:$16 sps:$4 sm:$0xff]  }
  0xd0   : > { %1100 = vmatprep.subr.bf16.mxu0 %v3261_v1  ;;  %1141 = vmatprep.subr.bf16.mxu1 %v3263_v60  ;;  %3821 = vst [vmem:[#allocation64_spill] sm:$0xff] %v3281_v62  ;;  %v426_v60 = vlaneseq }
  0xd3   : > { %1101 = vmatpush1.bf16.msra.mxu0 %v3267_v35  ;;  %1142 = vmatpush1.bf16.msra.mxu1 %v3269_v61  ;;  %v2785_v35 = vmov 1983009808   ;;  %v3289_v61 = vshrl.u32 %v426_v60, 7  ;;  %v452_v60 = vld [vmem:[%s2986_s5] sm:$0xff] }
  0xd4   : > { %1102 = vmatprep.subr.bf16.mxu0 %v3273_v0  ;;  %1143 = vmatprep.subr.bf16.mxu1 %v3275_v63  ;;  %v703_v1 = vunpack.c.l.s4 %v2785_v35 }
  0xd5   : > { %3822 = vst [vmem:[#allocation65_spill] sm:$0xff] %v3289_v61 }
  0xd6   : > { %v704_v4 = vunpack.c.0.s8 %v703_v1 }
  0xd7   : > { %1103 = vmatpush1.bf16.msra.mxu0 %v3279_v59  ;;  %1144 = vmatpush1.bf16.msra.mxu1 %v3281_v62 }
  0xd8   : > { %1180 = vmatprep.subr.bf16.mxu0 %v2997_v2  ;;  %1221 = vmatprep.subr.bf16.mxu1 %v2999_v3  ;;  %v3292_v0 = vsub.s32 %v704_v4, %v3289_v61 }
 0x16d   : > { %v648_v40 = vpop.f32.mrb[0].mxu0  ;;  %v689_v58 = vpop.f32.mrb[0].mxu1 }
 0x16e   : > { %v650_v63 = vpop.f32.mrb[1].mxu0  ;;  %v691_v59 = vpop.f32.mrb[1].mxu1 }
 0x16f   : > { %v700_v57 = vcombine.low %v648_v40, %v650_v63  ;;  %v701_v62 = vcombine.low %v689_v58, %v691_v59  ;;  %v652_v56 = vpop.f32.mrb[2].mxu0  ;;  %v693_v2 = vpop.f32.mrb[2].mxu1 }
 0x170   : > { %v653_v55 = vpop.f32.mrb[3].mxu0  ;;  %v694_v3 = vpop.f32.mrb[3].mxu1 }
 0x171   : > { %v708_v54 = vrot.slane %v700_v57, %v3292_v0  ;;  %v715_v35 = vrot.slane %v701_v62, %v3292_v0 }
 0x173   : > { %v716_v53 = vcombine.low %v708_v54, %v715_v35  ;;  %v449_v54 = vld [vmem:[#allocation3] sm:$0x3] }
 0x175   : > { %v718_v1 = vadd.f32 %v716_v53, %v452_v60 }
 0x177   : > { %v2084_v52 = vmul.f32 -1.442695, %v718_v1  ;;  %v726_v51 = vrot.slane %v718_v1, 2  ;;  %v737_v61 = vrot.slane %v718_v1, 6  ;;  %v734_v58 = vrot.slane %v718_v1, 4 }
 0x178   : > { %v3823_v1 = vmov 0  }
 0x179   : > { %2410 = vpow2.f32 %v2084_v52  ;;  %v2085_v4 = vmul.f32 -1.442695, %v726_v51  ;;  %v2086_v50 = vmul.f32 -1.442695, %v737_v61 }
 0x17b   : > { %2412 = vpow2.f32 %v2085_v4  ;;  %v3842_v4 = vld [vmem:[#allocation32_spill] sm:$0xff] }
 0x17c   : > { %2414 = vpow2.f32 %v2086_v50 }
 0x183   : > { %v2411_v63 = vpop.eup %2410 }
 0x184   : > { %v722_v56 = vadd.f32 1.0, %v2411_v63  ;;  %v3843_v63 = vld [vmem:[#allocation33_spill] sm:$0xff] }
 0x185   : > { %v2413_v2 = vpop.eup %2412 }
 0x186   : > { %2416 = vrcp.f32 %v722_v56  ;;  %v731_v3 = vadd.f32 1.0, %v2413_v2  ;;  %v2415_v55 = vpop.eup %2414  ;;  %v3845_v56 = vld [vmem:[#allocation35_spill] sm:$0xff]  ;;  %v3846_v2 = vld [vmem:[#allocation36_spill] sm:$0xff] }
 0x187   : > { %2418 = vtanh.f32 %v734_v58  ;;  %v742_v40 = vadd.f32 1.0, %v2415_v55  ;;  %v3844_v58 = vld [vmem:[#allocation34_spill] sm:$0xff] }
 0x188   : > { %2420 = vrcp.f32 %v731_v3  ;;  %v3847_v3 = vld [vmem:[#allocation37_spill] sm:$0xff]  ;;  %v3848_v55 = vld [vmem:[#allocation38_spill] sm:$0xff] }
 0x189   : > { %2422 = vrcp.f32 %v742_v40  ;;  %v3853_v40 = vld [vmem:[#allocation43_spill] sm:$0xff] }
 0x190   : > { %v2417_v57 = vpop.eup %2416 }
 0x191   : > { %v2419_v53 = vpop.eup %2418 }
 0x192   : > { %v2421_v59 = vpop.eup %2420  ;;  %v746_v51 = vmul.f32 %v2419_v53, %v2417_v57  ;;  %v3849_v57 = vld [vmem:[#allocation39_spill] sm:$0xff]  ;;  %v3851_v53 = vld [vmem:[#allocation41_spill] sm:$0xff] }
 0x193   : > { %v745_v52 = vmul.f32 %v2421_v59, %v449_v54  ;;  %v2423_v61 = vpop.eup %2422  ;;  %v3850_v54 = vld [vmem:[#allocation40_spill] sm:$0xff]  ;;  %v3852_v59 = vld [vmem:[#allocation42_spill] sm:$0xff] }
 0x195   : > { %v3297_v62 = vadd.f32 %v746_v51, %v745_v52  ;;  %v3854_v52 = vld [vmem:[#allocation44_spill] sm:$0xff]  ;;  %v3855_v51 = vld [vmem:[#allocation45_spill] sm:$0xff] }
 0x197   : > { %2424 = vtanh.f32 %v3297_v62 }
 0x1a1   : > { %v2425_v35 = vpop.eup %2424 }
 0x1a2   : > { %v749_v50 = vmul.f32 %v2425_v35, %v2423_v61  ;;  %v3856_v61 = vld [vmem:[#allocation46_spill] sm:$0xff]  ;;  %v3857_v35 = vld [vmem:[#allocation47_spill] sm:$0xff] }
 0x1a4   : > { %v750_v60 = vpack.c.bf16 %v749_v50, %v749_v50  ;;  %v3858_v50 = vld [vmem:[#allocation48_spill] sm:$0xff] }
 0x1a6   : > { %1105 = vmatmul.mubr.bf16.vlgmr.msra.gmra.mrb[4].mxu0 %v750_v60  ;;  %1146 = vmatmul.mubr.bf16.vlgmr.msra.gmra.mrb[4].mxu1 %v750_v60 }
 0x1a7   : > { %1181 = vmatpush1.bf16.msra.mxu0 %v3004_v5  ;;  %1222 = vmatpush1.bf16.msra.mxu1 %v3006_v6  ;;  %v3824_v5 = vld [vmem:[#allocation14_spill] sm:$0xff]  ;;  %v3825_v6 = vld [vmem:[#allocation15_spill] sm:$0xff] }
 0x1a8   : > { %1182 = vmatprep.subr.bf16.mxu0 %v3009_v7  ;;  %1223 = vmatprep.subr.bf16.mxu1 %v3013_v8  ;;  %v3826_v7 = vld [vmem:[#allocation16_spill] sm:$0xff]  ;;  %v3827_v8 = vld [vmem:[#allocation17_spill] sm:$0xff] }
 0x1a9   : > { %1212 = vmatprep.mubr.bf16.mxu0 %v3823_v1  ;;  %1253 = vmatprep.mubr.bf16.mxu1 %v3823_v1 }
 0x1ab   : > { %1183 = vmatpush1.bf16.msra.mxu0 %v3015_v9  ;;  %1224 = vmatpush1.bf16.msra.mxu1 %v3018_v10  ;;  %v3828_v9 = vld [vmem:[#allocation18_spill] sm:$0xff]  ;;  %v3829_v10 = vld [vmem:[#allocation19_spill] sm:$0xff] }
 0x1ac   : > { %1184 = vmatprep.subr.bf16.mxu0 %v3021_v11  ;;  %1225 = vmatprep.subr.bf16.mxu1 %v3023_v12  ;;  %v3830_v11 = vld [vmem:[#allocation20_spill] sm:$0xff]  ;;  %v3831_v12 = vld [vmem:[#allocation21_spill] sm:$0xff] }
 0x1af   : > { %1185 = vmatpush1.bf16.msra.mxu0 %v3025_v13  ;;  %1226 = vmatpush1.bf16.msra.mxu1 %v3027_v14  ;;  %v3832_v13 = vld [vmem:[#allocation22_spill] sm:$0xff]  ;;  %v3833_v14 = vld [vmem:[#allocation23_spill] sm:$0xff] }
 0x1b0   : > { %1186 = vmatprep.subr.bf16.mxu0 %v3031_v15  ;;  %1227 = vmatprep.subr.bf16.mxu1 %v3035_v16  ;;  %v3834_v15 = vld [vmem:[#allocation24_spill] sm:$0xff]  ;;  %v3835_v16 = vld [vmem:[#allocation25_spill] sm:$0xff] }
 0x1b3   : > { %1187 = vmatpush1.bf16.msra.mxu0 %v3037_v17  ;;  %1228 = vmatpush1.bf16.msra.mxu1 %v3041_v18  ;;  %v3836_v17 = vld [vmem:[#allocation26_spill] sm:$0xff]  ;;  %v3837_v18 = vld [vmem:[#allocation27_spill] sm:$0xff] }
 0x1b4   : > { %1188 = vmatprep.subr.bf16.mxu0 %v3043_v19  ;;  %1229 = vmatprep.subr.bf16.mxu1 %v3047_v20  ;;  %v3838_v19 = vld [vmem:[#allocation28_spill] sm:$0xff]  ;;  %v3839_v20 = vld [vmem:[#allocation29_spill] sm:$0xff] }
 0x1b7   : > { %1189 = vmatpush1.bf16.msra.mxu0 %v3049_v21  ;;  %1230 = vmatpush1.bf16.msra.mxu1 %v3051_v22  ;;  %v3840_v21 = vld [vmem:[#allocation30_spill] sm:$0xff]  ;;  %v3841_v22 = vld [vmem:[#allocation31_spill] sm:$0xff] }
 0x1b8   : > { %1190 = vmatprep.subr.bf16.mxu0 %v3055_v23  ;;  %1231 = vmatprep.subr.bf16.mxu1 %v3059_v24 }
 0x1bb   : > { %1191 = vmatpush1.bf16.msra.mxu0 %v3063_v25  ;;  %1232 = vmatpush1.bf16.msra.mxu1 %v3065_v26 }
 0x1bc   : > { %1192 = vmatprep.subr.bf16.mxu0 %v3069_v27  ;;  %1233 = vmatprep.subr.bf16.mxu1 %v3071_v28 }
 0x1bf   : > { %1193 = vmatpush1.bf16.msra.mxu0 %v3073_v29  ;;  %1234 = vmatpush1.bf16.msra.mxu1 %v3075_v30 }
 0x1c0   : > { %1194 = vmatprep.subr.bf16.mxu0 %v3079_v31  ;;  %1235 = vmatprep.subr.bf16.mxu1 %v3083_v32 }
 0x1c3   : > { %1195 = vmatpush1.bf16.msra.mxu0 %v3085_v33  ;;  %1236 = vmatpush1.bf16.msra.mxu1 %v3087_v34 }
 0x1c4   : > { %1318 = vmatprep.subr.bf16.mxu0 %v3089_v36  ;;  %1359 = vmatprep.subr.bf16.mxu1 %v3091_v37 }
 0x1c6   : > { %1213 = vmatmul.mubr.bf16.vlgmr.msra.gmra.mrb[8].mxu0 %v750_v60  ;;  %1254 = vmatmul.mubr.bf16.vlgmr.msra.gmra.mrb[8].mxu1 %v750_v60  ;;  %v3859_v60 = vld [vmem:[#allocation49_spill] sm:$0xff] }
 0x1c7   : > { %1319 = vmatpush1.bf16.msra.mxu0 %v3097_v38  ;;  %1360 = vmatpush1.bf16.msra.mxu1 %v3099_v39 }
 0x1c8   : > { %1320 = vmatprep.subr.bf16.mxu0 %v3101_v41  ;;  %1361 = vmatprep.subr.bf16.mxu1 %v3103_v42 }
 0x1cb   : > { %1321 = vmatpush1.bf16.msra.mxu0 %v3109_v43  ;;  %1362 = vmatpush1.bf16.msra.mxu1 %v3111_v44 }
 0x1cc   : > { %1322 = vmatprep.subr.bf16.mxu0 %v3119_v45  ;;  %1363 = vmatprep.subr.bf16.mxu1 %v3121_v46 }
 0x1cf   : > { %1323 = vmatpush1.bf16.msra.mxu0 %v3125_v47  ;;  %1364 = vmatpush1.bf16.msra.mxu1 %v3127_v48 }
 0x1d0   : > { %1324 = vmatprep.subr.bf16.mxu0 %v3131_v49  ;;  %1365 = vmatprep.subr.bf16.mxu1 %v3824_v5 }
 0x1d3   : > { %1325 = vmatpush1.bf16.msra.mxu0 %v3825_v6  ;;  %1366 = vmatpush1.bf16.msra.mxu1 %v3826_v7 }
 0x1d4   : > { %1326 = vmatprep.subr.bf16.mxu0 %v3827_v8  ;;  %1367 = vmatprep.subr.bf16.mxu1 %v3828_v9 }
 0x1d7   : > { %1327 = vmatpush1.bf16.msra.mxu0 %v3829_v10  ;;  %1368 = vmatpush1.bf16.msra.mxu1 %v3830_v11 }
 0x1d8   : > { %1328 = vmatprep.subr.bf16.mxu0 %v3831_v12  ;;  %1369 = vmatprep.subr.bf16.mxu1 %v3832_v13 }
 0x1db   : > { %1329 = vmatpush1.bf16.msra.mxu0 %v3833_v14  ;;  %1370 = vmatpush1.bf16.msra.mxu1 %v3834_v15 }
 0x1dc   : > { %1330 = vmatprep.subr.bf16.mxu0 %v3835_v16  ;;  %1371 = vmatprep.subr.bf16.mxu1 %v3836_v17 }
 0x1df   : > { %1331 = vmatpush1.bf16.msra.mxu0 %v3837_v18  ;;  %1372 = vmatpush1.bf16.msra.mxu1 %v3838_v19 }
 0x1e0   : > { %1332 = vmatprep.subr.bf16.mxu0 %v3839_v20  ;;  %1373 = vmatprep.subr.bf16.mxu1 %v3840_v21 }
 0x1e3   : > { %1333 = vmatpush1.bf16.msra.mxu0 %v3841_v22  ;;  %1374 = vmatpush1.bf16.msra.mxu1 %v3842_v4 }
 0x1e4   : > { %1334 = vmatprep.subr.bf16.mxu0 %v3843_v63  ;;  %1375 = vmatprep.subr.bf16.mxu1 %v3844_v58 }
 0x1e7   : > { %1335 = vmatpush1.bf16.msra.mxu0 %v3845_v56  ;;  %1376 = vmatpush1.bf16.msra.mxu1 %v3846_v2 }
 0x1e8   : > { %1336 = vmatprep.subr.bf16.mxu0 %v3847_v3  ;;  %1377 = vmatprep.subr.bf16.mxu1 %v3848_v55 }
 0x1eb   : > { %1337 = vmatpush1.bf16.msra.mxu0 %v3849_v57  ;;  %1378 = vmatpush1.bf16.msra.mxu1 %v3850_v54  ;;  %v3860_v57 = vld [vmem:[#allocation50_spill] sm:$0xff]  ;;  %v3861_v54 = vld [vmem:[#allocation51_spill] sm:$0xff] }
 0x1ec   : > { %1338 = vmatprep.subr.bf16.mxu0 %v3851_v53  ;;  %1379 = vmatprep.subr.bf16.mxu1 %v3852_v59  ;;  %v3862_v53 = vld [vmem:[#allocation52_spill] sm:$0xff]  ;;  %v3863_v59 = vld [vmem:[#allocation53_spill] sm:$0xff] }
 0x1ef   : > { %1339 = vmatpush1.bf16.msra.mxu0 %v3853_v40  ;;  %1380 = vmatpush1.bf16.msra.mxu1 %v3854_v52  ;;  %v3864_v40 = vld [vmem:[#allocation54_spill] sm:$0xff]  ;;  %v3865_v52 = vld [vmem:[#allocation55_spill] sm:$0xff] }
 0x1f0   : > { %1340 = vmatprep.subr.bf16.mxu0 %v3855_v51  ;;  %1381 = vmatprep.subr.bf16.mxu1 %v3856_v61  ;;  %v3866_v51 = vld [vmem:[#allocation56_spill] sm:$0xff]  ;;  %v3867_v61 = vld [vmem:[#allocation57_spill] sm:$0xff] }
 0x1f3   : > { %1341 = vmatpush1.bf16.msra.mxu0 %v3857_v35  ;;  %1382 = vmatpush1.bf16.msra.mxu1 %v3858_v50  ;;  %v3868_v35 = vld [vmem:[#allocation58_spill] sm:$0xff]  ;;  %v3869_v50 = vld [vmem:[#allocation59_spill] sm:$0xff] }
 0x1f4   : > { %1342 = vmatprep.subr.bf16.mxu0 %v3859_v60  ;;  %1383 = vmatprep.subr.bf16.mxu1 %v3860_v57  ;;  %v3870_v60 = vld [vmem:[#allocation60_spill] sm:$0xff]  ;;  %v3871_v57 = vld [vmem:[#allocation61_spill] sm:$0xff] }
 0x1f7   : > { %1343 = vmatpush1.bf16.msra.mxu0 %v3861_v54  ;;  %1384 = vmatpush1.bf16.msra.mxu1 %v3862_v53  ;;  %v3872_v54 = vld [vmem:[#allocation62_spill] sm:$0xff]  ;;  %v3873_v53 = vld [vmem:[#allocation63_spill] sm:$0xff] }
 0x1f8   : > { %1344 = vmatprep.subr.bf16.mxu0 %v3863_v59  ;;  %1385 = vmatprep.subr.bf16.mxu1 %v3864_v40  ;;  %v3874_v59 = vld [vmem:[#allocation64_spill] sm:$0xff] }
 0x1f9   : > { %v3875_v40 = vld [vmem:[#allocation12_spill] sm:$0xff] }
 0x1fb   : > { %1345 = vmatpush1.bf16.msra.mxu0 %v3865_v52  ;;  %1386 = vmatpush1.bf16.msra.mxu1 %v3866_v51  ;;  %v3876_v52 = vld [vmem:[#allocation13_spill] sm:$0xff] }
 0x1fc   : > { %1346 = vmatprep.subr.bf16.mxu0 %v3867_v61  ;;  %1387 = vmatprep.subr.bf16.mxu1 %v3868_v35  ;;  %v3877_v51 = vld [vmem:[#allocation65_spill] sm:$0xff] }
 0x1fd   : > { %v428_v61 = vsub.s32 0, %v3877_v51 }
 0x1ff   : > { %1347 = vmatpush1.bf16.msra.mxu0 %v3869_v50  ;;  %1388 = vmatpush1.bf16.msra.mxu1 %v3870_v60  ;;  %v424_v50 = vld [vmem:[%s3639_s3] sm:$0xf]  ;;  %v432_v60 = vsub.s32 1, %v3877_v51 }
 0x200   : > { %1348 = vmatprep.subr.bf16.mxu0 %v3871_v57  ;;  %1389 = vmatprep.subr.bf16.mxu1 %v3872_v54  ;;  %v3403_v35 = vrot.slane %v424_v50, %v428_v61 }
 0x201   : > { %v3405_v57 = vrot.slane %v424_v50, %v432_v60  ;;  %v436_v60 = vsub.s32 2, %v3877_v51 }
 0x202   : > { %3878 = vst [vmem:[#allocation14_spill] sm:$0xff] %v3403_v35 }
 0x203   : > { %1349 = vmatpush1.bf16.msra.mxu0 %v3873_v53  ;;  %1390 = vmatpush1.bf16.msra.mxu1 %v3874_v59  ;;  %v440_v59 = vsub.s32 3, %v3877_v51  ;;  %v3414_v20 = vrot.slane %v424_v50, %v436_v60 }
 0x204   : > { %1426 = vmatprep.subr.bf16.mxu0 %v3875_v40  ;;  %1467 = vmatprep.subr.bf16.mxu1 %v3876_v52 }
 0x205   : > { %v3410_v61 = vrot.slane %v424_v50, %v440_v59  ;;  %3880 = vst [vmem:[#allocation16_spill] sm:$0xff] %v3414_v20 }
 0x207   : > { %3879 = vst [vmem:[#allocation15_spill] sm:$0xff] %v3410_v61 }
 0x279   : > { %v1106_v54 = vpop.f32.mrb[4].mxu0  ;;  %v1147_v53 = vpop.f32.mrb[4].mxu1 }
 0x27a   : > { %v1107_v40 = vadd.f32 %v1106_v54, %v3403_v35  ;;  %v1108_v55 = vpop.f32.mrb[5].mxu0  ;;  %v1149_v52 = vpop.f32.mrb[5].mxu1  ;;  %v1148_v35 = vadd.f32 %v1147_v53, %v3414_v20 }
 0x27b   : > { %v1109_v3 = vadd.f32 %v1108_v55, %v3405_v57  ;;  %v1110_v2 = vpop.f32.mrb[6].mxu0  ;;  %v1151_v56 = vpop.f32.mrb[6].mxu1  ;;  %v1150_v21 = vadd.f32 %v1149_v52, %v3410_v61 }
 0x27c   : > { %v2151_v58 = vmul.f32 -1.442695, %v1107_v40  ;;  %v1111_v63 = vpop.f32.mrb[7].mxu0  ;;  %v1152_v4 = vpop.f32.mrb[7].mxu1 }
 0x27d   : > { %v2152_v22 = vmul.f32 -1.442695, %v1109_v3  ;;  %v2153_v54 = vmul.f32 -1.442695, %v1150_v21  ;;  %v451_v3 = vld [vmem:[#allocation3 + $0x2] sm:$0x3] }
 0x27e   : > { %2426 = vpow2.f32 %v2151_v58 }
 0x27f   : > { %2428 = vpow2.f32 %v2152_v22 }
 0x280   : > { %2430 = vpow2.f32 %v2153_v54 }
 0x281   : > { %2432 = vtanh.f32 %v1148_v35 }
 0x288   : > { %v2427_v55 = vpop.eup %2426 }
 0x289   : > { %v2429_v2 = vpop.eup %2428  ;;  %v1157_v56 = vadd.f32 1.0, %v2427_v55 }
 0x28a   : > { %v1163_v4 = vadd.f32 1.0, %v2429_v2  ;;  %v2431_v63 = vpop.eup %2430 }
 0x28b   : > { %2434 = vrcp.f32 %v1157_v56  ;;  %v2433_v58 = vpop.eup %2432  ;;  %v1170_v40 = vadd.f32 1.0, %v2431_v63 }
 0x28c   : > { %2436 = vrcp.f32 %v1163_v4 }
 0x28d   : > { %2438 = vrcp.f32 %v1170_v40 }
 0x295   : > { %v2435_v59 = vpop.eup %2434 }
 0x296   : > { %v2437_v22 = vpop.eup %2436  ;;  %v1174_v51 = vmul.f32 %v2435_v59, %v2433_v58 }
 0x297   : > { %v1173_v50 = vmul.f32 %v2437_v22, %v451_v3  ;;  %v2154_v3 = vld [vmem:[%s2986_s5 + $0x8] sm:$0xff]  ;;  %v2439_v40 = vpop.eup %2438 }
 0x299   : > { %v1214_v21 = vpop.f32.mrb[8].mxu0  ;;  %v1255_v52 = vpop.f32.mrb[8].mxu1  ;;  %v3417_v53 = vadd.f32 %v1174_v51, %v1173_v50 }
 0x29a   : > { %v1216_v60 = vpop.f32.mrb[9].mxu0  ;;  %v1257_v54 = vpop.f32.mrb[9].mxu1 }
 0x29b   : > { %v1266_v35 = vcombine.low %v1214_v21, %v1216_v60  ;;  %v1267_v55 = vcombine.low %v1255_v52, %v1257_v54  ;;  %v1218_v2 = vpop.f32.mrb[10].mxu0  ;;  %v1259_v56 = vpop.f32.mrb[10].mxu1  ;;  %2440 = vtanh.f32 %v3417_v53 }
 0x29c   : > { %v1219_v4 = vpop.f32.mrb[11].mxu0  ;;  %v1260_v20 = vpop.f32.mrb[11].mxu1 }
 0x29d   : > { %v1274_v58 = vrot.slane %v1266_v35, %v3292_v0  ;;  %v1281_v63 = vrot.slane %v1267_v55, %v3292_v0 }
 0x29f   : > { %v1282_v59 = vcombine.low %v1274_v58, %v1281_v63 }
 0x2a1   : > { %v1284_v22 = vadd.f32 %v2154_v3, %v1282_v59 }
 0x2a3   : > { %v2155_v51 = vmul.f32 -1.442695, %v1284_v22  ;;  %v1292_v50 = vrot.slane %v1284_v22, 2  ;;  %v1303_v54 = vrot.slane %v1284_v22, 6  ;;  %v1300_v35 = vrot.slane %v1284_v22, 4 }
 0x2a5   : > { %v2441_v61 = vpop.eup %2440  ;;  %2442 = vpow2.f32 %v2155_v51  ;;  %v2156_v21 = vmul.f32 -1.442695, %v1292_v50  ;;  %v2157_v20 = vmul.f32 -1.442695, %v1303_v54  ;;  %v3427_v54 = vld [vmem:[#allocation7] ss:$16 sps:$4 sm:$0xff]  }
 0x2a6   : > { %v1177_v52 = vmul.f32 %v2441_v61, %v2439_v40 }
 0x2a7   : > { %2444 = vpow2.f32 %v2156_v21 }
 0x2a8   : > { %v1317_v60 = vpack.c.bf16 %v1177_v52, %v1177_v52  ;;  %2446 = vpow2.f32 %v2157_v20  ;;  %v3430_v20 = vld [vmem:[#allocation7 + $0x8] ss:$16 sps:$4 sm:$0xff]  }
 0x2aa   : > { %1350 = vmatprep.mubr.bf16.mxu0 %v1317_v60  ;;  %1391 = vmatprep.mubr.bf16.mxu1 %v1317_v60 }
 0x2af   : > { %v2443_v2 = vpop.eup %2442 }
 0x2b0   : > { %v1288_v56 = vadd.f32 1.0, %v2443_v2  ;;  %v3436_v2 = vld [vmem:[#allocation7 + $0x2c] ss:$16 sps:$4 sm:$0xff]  }
 0x2b1   : > { %v2445_v55 = vpop.eup %2444 }
 0x2b2   : > { %2448 = vrcp.f32 %v1288_v56  ;;  %v1297_v4 = vadd.f32 1.0, %v2445_v55  ;;  %v2447_v58 = vpop.eup %2446  ;;  %v3444_v56 = vld [vmem:[#allocation7 + $0x28] ss:$16 sps:$4 sm:$0xff]   ;;  %v3447_v55 = vld [vmem:[#allocation7 + $0x44] ss:$16 sps:$4 sm:$0xff]  }
 0x2b3   : > { %2450 = vtanh.f32 %v1300_v35  ;;  %v1308_v61 = vadd.f32 1.0, %v2447_v58  ;;  %v3441_v35 = vld [vmem:[#allocation7 + $0x20] ss:$16 sps:$4 sm:$0xff]  }
 0x2b4   : > { %2452 = vrcp.f32 %v1297_v4  ;;  %v3450_v4 = vld [vmem:[#allocation7 + $0x4c] ss:$16 sps:$4 sm:$0xff]   ;;  %v3453_v58 = vld [vmem:[#allocation7 + $0x40] ss:$16 sps:$4 sm:$0xff]  }
 0x2b5   : > { %2454 = vrcp.f32 %v1308_v61  ;;  %v3465_v61 = vld [vmem:[#allocation7 + $0x60] ss:$16 sps:$4 sm:$0xff]  }
 0x2bc   : > { %v2449_v63 = vpop.eup %2448 }
 0x2bd   : > { %v2451_v3 = vpop.eup %2450 }
 0x2be   : > { %v2453_v59 = vpop.eup %2452  ;;  %v1312_v50 = vmul.f32 %v2451_v3, %v2449_v63  ;;  %v3456_v63 = vld [vmem:[#allocation7 + $0x48] ss:$16 sps:$4 sm:$0xff]   ;;  %v3459_v3 = vld [vmem:[#allocation7 + $0x64] ss:$16 sps:$4 sm:$0xff]  }
 0x2bf   : > { %v1311_v51 = vmul.f32 %v2453_v59, %v3297_v62  ;;  %v2455_v22 = vpop.eup %2454  ;;  %v3433_v62 = vld [vmem:[#allocation7 + $0x24] ss:$16 sps:$4 sm:$0xff]   ;;  %v3462_v59 = vld [vmem:[#allocation7 + $0x6c] ss:$16 sps:$4 sm:$0xff]  }
 0x2c1   : > { %v3424_v40 = vadd.f32 %v1312_v50, %v1311_v51  ;;  %v3468_v51 = vld [vmem:[#allocation7 + $0x68] ss:$16 sps:$4 sm:$0xff]   ;;  %v3471_v50 = vld [vmem:[#allocation7 + $0x84] ss:$16 sps:$4 sm:$0xff]  }
 0x2c3   : > { %2456 = vtanh.f32 %v3424_v40 }
 0x2cd   : > { %v2457_v21 = vpop.eup %2456 }
 0x2ce   : > { %v1315_v52 = vmul.f32 %v2457_v21, %v2455_v22  ;;  %v3474_v22 = vld [vmem:[#allocation7 + $0x8c] ss:$16 sps:$4 sm:$0xff]   ;;  %v3477_v21 = vld [vmem:[#allocation7 + $0x80] ss:$16 sps:$4 sm:$0xff]  }
 0x2d0   : > { %v1316_v60 = vpack.c.bf16 %v1315_v52, %v1315_v52  ;;  %v3480_v52 = vld [vmem:[#allocation7 + $0x88] ss:$16 sps:$4 sm:$0xff]  }
 0x2d2   : > { %1351 = vmatmul.mubr.bf16.vlgmr.msra.gmra.mrb[12].mxu0 %v1316_v60  ;;  %1392 = vmatmul.mubr.bf16.vlgmr.msra.gmra.mrb[12].mxu1 %v1316_v60 }
 0x2d3   : > { %1427 = vmatpush1.bf16.msra.mxu0 %v3427_v54  ;;  %1468 = vmatpush1.bf16.msra.mxu1 %v3430_v20 }
 0x2d4   : > { %1428 = vmatprep.subr.bf16.mxu0 %v3433_v62  ;;  %1469 = vmatprep.subr.bf16.mxu1 %v3436_v2 }
 0x2d5   : > { %1458 = vmatprep.mubr.bf16.mxu0 %v3823_v1  ;;  %1499 = vmatprep.mubr.bf16.mxu1 %v3823_v1 }
 0x2d7   : > { %1429 = vmatpush1.bf16.msra.mxu0 %v3441_v35  ;;  %1470 = vmatpush1.bf16.msra.mxu1 %v3444_v56 }
 0x2d8   : > { %1430 = vmatprep.subr.bf16.mxu0 %v3447_v55  ;;  %1471 = vmatprep.subr.bf16.mxu1 %v3450_v4 }
 0x2db   : > { %1431 = vmatpush1.bf16.msra.mxu0 %v3453_v58  ;;  %1472 = vmatpush1.bf16.msra.mxu1 %v3456_v63 }
 0x2dc   : > { %1432 = vmatprep.subr.bf16.mxu0 %v3459_v3  ;;  %1473 = vmatprep.subr.bf16.mxu1 %v3462_v59 }
 0x2df   : > { %1433 = vmatpush1.bf16.msra.mxu0 %v3465_v61  ;;  %1474 = vmatpush1.bf16.msra.mxu1 %v3468_v51 }
 0x2e0   : > { %1434 = vmatprep.subr.bf16.mxu0 %v3471_v50  ;;  %1475 = vmatprep.subr.bf16.mxu1 %v3474_v22 }
 0x2e3   : > { %1435 = vmatpush1.bf16.msra.mxu0 %v3477_v21  ;;  %1476 = vmatpush1.bf16.msra.mxu1 %v3480_v52 }
 0x2e4   : > { %1436 = vmatprep.subr.bf16.mxu0 %v3055_v23  ;;  %1477 = vmatprep.subr.bf16.mxu1 %v3059_v24  ;;  %v3881_v23 = vld [vmem:[#allocation29_spill] sm:$0xff]  ;;  %v3882_v24 = vld [vmem:[#allocation30_spill] sm:$0xff] }
 0x2e7   : > { %1437 = vmatpush1.bf16.msra.mxu0 %v3063_v25  ;;  %1478 = vmatpush1.bf16.msra.mxu1 %v3065_v26  ;;  %v3883_v25 = vld [vmem:[#allocation31_spill] sm:$0xff]  ;;  %v3884_v26 = vld [vmem:[#allocation32_spill] sm:$0xff] }
 0x2e8   : > { %1438 = vmatprep.subr.bf16.mxu0 %v3069_v27  ;;  %1479 = vmatprep.subr.bf16.mxu1 %v3071_v28  ;;  %v3885_v27 = vld [vmem:[#allocation33_spill] sm:$0xff]  ;;  %v3886_v28 = vld [vmem:[#allocation34_spill] sm:$0xff] }
 0x2eb   : > { %1439 = vmatpush1.bf16.msra.mxu0 %v3073_v29  ;;  %1480 = vmatpush1.bf16.msra.mxu1 %v3075_v30  ;;  %v3887_v29 = vld [vmem:[#allocation35_spill] sm:$0xff]  ;;  %v3888_v30 = vld [vmem:[#allocation36_spill] sm:$0xff] }
 0x2ec   : > { %1440 = vmatprep.subr.bf16.mxu0 %v3079_v31  ;;  %1481 = vmatprep.subr.bf16.mxu1 %v3083_v32  ;;  %v3889_v31 = vld [vmem:[#allocation37_spill] sm:$0xff]  ;;  %v3890_v32 = vld [vmem:[#allocation38_spill] sm:$0xff] }
 0x2ef   : > { %1441 = vmatpush1.bf16.msra.mxu0 %v3085_v33  ;;  %1482 = vmatpush1.bf16.msra.mxu1 %v3087_v34  ;;  %v3891_v33 = vld [vmem:[#allocation39_spill] sm:$0xff]  ;;  %v3892_v34 = vld [vmem:[#allocation40_spill] sm:$0xff] }
 0x2f0   : > { %1564 = vmatprep.subr.bf16.mxu0 %v3089_v36  ;;  %1605 = vmatprep.subr.bf16.mxu1 %v3091_v37  ;;  %v3893_v36 = vld [vmem:[#allocation41_spill] sm:$0xff]  ;;  %v3894_v37 = vld [vmem:[#allocation42_spill] sm:$0xff] }
 0x2f2   : > { %1459 = vmatmul.mubr.bf16.vlgmr.msra.gmra.mrb[16].mxu0 %v1316_v60  ;;  %1500 = vmatmul.mubr.bf16.vlgmr.msra.gmra.mrb[16].mxu1 %v1316_v60  ;;  %v3917_v60 = vld [vmem:[#allocation14_spill] sm:$0xff] }
 0x2f3   : > { %1565 = vmatpush1.bf16.msra.mxu0 %v3097_v38  ;;  %1606 = vmatpush1.bf16.msra.mxu1 %v3099_v39  ;;  %v3895_v38 = vld [vmem:[#allocation43_spill] sm:$0xff]  ;;  %v3896_v39 = vld [vmem:[#allocation44_spill] sm:$0xff] }
 0x2f4   : > { %1566 = vmatprep.subr.bf16.mxu0 %v3101_v41  ;;  %1607 = vmatprep.subr.bf16.mxu1 %v3103_v42  ;;  %v3897_v41 = vld [vmem:[#allocation45_spill] sm:$0xff]  ;;  %v3898_v42 = vld [vmem:[#allocation46_spill] sm:$0xff] }
 0x2f7   : > { %1567 = vmatpush1.bf16.msra.mxu0 %v3109_v43  ;;  %1608 = vmatpush1.bf16.msra.mxu1 %v3111_v44  ;;  %v3899_v43 = vld [vmem:[#allocation47_spill] sm:$0xff]  ;;  %v3900_v44 = vld [vmem:[#allocation48_spill] sm:$0xff] }
 0x2f8   : > { %1568 = vmatprep.subr.bf16.mxu0 %v3119_v45  ;;  %1609 = vmatprep.subr.bf16.mxu1 %v3121_v46  ;;  %v3901_v45 = vld [vmem:[#allocation49_spill] sm:$0xff]  ;;  %v3902_v46 = vld [vmem:[#allocation50_spill] sm:$0xff] }
 0x2fb   : > { %1569 = vmatpush1.bf16.msra.mxu0 %v3125_v47  ;;  %1610 = vmatpush1.bf16.msra.mxu1 %v3127_v48  ;;  %v3903_v47 = vld [vmem:[#allocation51_spill] sm:$0xff]  ;;  %v3904_v48 = vld [vmem:[#allocation52_spill] sm:$0xff] }
 0x2fc   : > { %1570 = vmatprep.subr.bf16.mxu0 %v3131_v49  ;;  %1611 = vmatprep.subr.bf16.mxu1 %v3824_v5  ;;  %v3905_v49 = vld [vmem:[#allocation53_spill] sm:$0xff]  ;;  %v3906_v5 = vld [vmem:[#allocation54_spill] sm:$0xff] }
 0x2ff   : > { %1571 = vmatpush1.bf16.msra.mxu0 %v3825_v6  ;;  %1612 = vmatpush1.bf16.msra.mxu1 %v3826_v7  ;;  %v3907_v6 = vld [vmem:[#allocation55_spill] sm:$0xff]  ;;  %v3908_v7 = vld [vmem:[#allocation56_spill] sm:$0xff] }
 0x300   : > { %1572 = vmatprep.subr.bf16.mxu0 %v3827_v8  ;;  %1613 = vmatprep.subr.bf16.mxu1 %v3828_v9  ;;  %v3909_v8 = vld [vmem:[#allocation57_spill] sm:$0xff]  ;;  %v3910_v9 = vld [vmem:[#allocation58_spill] sm:$0xff] }
 0x303   : > { %1573 = vmatpush1.bf16.msra.mxu0 %v3829_v10  ;;  %1614 = vmatpush1.bf16.msra.mxu1 %v3830_v11  ;;  %v3911_v10 = vld [vmem:[#allocation59_spill] sm:$0xff]  ;;  %v3912_v11 = vld [vmem:[#allocation60_spill] sm:$0xff] }
 0x304   : > { %1574 = vmatprep.subr.bf16.mxu0 %v3831_v12  ;;  %1615 = vmatprep.subr.bf16.mxu1 %v3832_v13  ;;  %v3913_v12 = vld [vmem:[#allocation61_spill] sm:$0xff]  ;;  %v3914_v13 = vld [vmem:[#allocation62_spill] sm:$0xff] }
 0x307   : > { %1575 = vmatpush1.bf16.msra.mxu0 %v3833_v14  ;;  %1616 = vmatpush1.bf16.msra.mxu1 %v3834_v15  ;;  %v3915_v14 = vld [vmem:[#allocation63_spill] sm:$0xff]  ;;  %v3916_v15 = vld [vmem:[#allocation64_spill] sm:$0xff] }
 0x308   : > { %1576 = vmatprep.subr.bf16.mxu0 %v3835_v16  ;;  %1617 = vmatprep.subr.bf16.mxu1 %v3836_v17  ;;  %v2556_v16 = vld [vmem:[#allocation7 + $0x4] ss:$16 sps:$4 sm:$0xff]   ;;  %v2557_v17 = vld [vmem:[#allocation7 + $0xc] ss:$16 sps:$4 sm:$0xff]  }
 0x30b   : > { %1577 = vmatpush1.bf16.msra.mxu0 %v3837_v18  ;;  %1618 = vmatpush1.bf16.msra.mxu1 %v3838_v19 }
 0x30c   : > { %1578 = vmatprep.subr.bf16.mxu0 %v3881_v23  ;;  %1619 = vmatprep.subr.bf16.mxu1 %v3882_v24 }
 0x30f   : > { %1579 = vmatpush1.bf16.msra.mxu0 %v3883_v25  ;;  %1620 = vmatpush1.bf16.msra.mxu1 %v3884_v26 }
 0x310   : > { %1580 = vmatprep.subr.bf16.mxu0 %v3885_v27  ;;  %1621 = vmatprep.subr.bf16.mxu1 %v3886_v28 }
 0x313   : > { %1581 = vmatpush1.bf16.msra.mxu0 %v3887_v29  ;;  %1622 = vmatpush1.bf16.msra.mxu1 %v3888_v30 }
 0x314   : > { %1582 = vmatprep.subr.bf16.mxu0 %v3889_v31  ;;  %1623 = vmatprep.subr.bf16.mxu1 %v3890_v32 }
 0x317   : > { %1583 = vmatpush1.bf16.msra.mxu0 %v3891_v33  ;;  %1624 = vmatpush1.bf16.msra.mxu1 %v3892_v34  ;;  %v3918_v33 = vld [vmem:[#allocation15_spill] sm:$0xff] }
 0x318   : > { %1584 = vmatprep.subr.bf16.mxu0 %v3893_v36  ;;  %1625 = vmatprep.subr.bf16.mxu1 %v3894_v37  ;;  %v3919_v37 = vld [vmem:[#allocation16_spill] sm:$0xff] }
 0x31b   : > { %1585 = vmatpush1.bf16.msra.mxu0 %v3895_v38  ;;  %1626 = vmatpush1.bf16.msra.mxu1 %v3896_v39 }
 0x31c   : > { %1586 = vmatprep.subr.bf16.mxu0 %v3897_v41  ;;  %1627 = vmatprep.subr.bf16.mxu1 %v3898_v42 }
 0x31f   : > { %1587 = vmatpush1.bf16.msra.mxu0 %v3899_v43  ;;  %1628 = vmatpush1.bf16.msra.mxu1 %v3900_v44 }
 0x320   : > { %1588 = vmatprep.subr.bf16.mxu0 %v3901_v45  ;;  %1629 = vmatprep.subr.bf16.mxu1 %v3902_v46 }
 0x323   : > { %1589 = vmatpush1.bf16.msra.mxu0 %v3903_v47  ;;  %1630 = vmatpush1.bf16.msra.mxu1 %v3904_v48 }
 0x324   : > { %1590 = vmatprep.subr.bf16.mxu0 %v3905_v49  ;;  %1631 = vmatprep.subr.bf16.mxu1 %v3906_v5 }
 0x327   : > { %1591 = vmatpush1.bf16.msra.mxu0 %v3907_v6  ;;  %1632 = vmatpush1.bf16.msra.mxu1 %v3908_v7 }
 0x328   : > { %1592 = vmatprep.subr.bf16.mxu0 %v3909_v8  ;;  %1633 = vmatprep.subr.bf16.mxu1 %v3910_v9 }
 0x32b   : > { %1593 = vmatpush1.bf16.msra.mxu0 %v3911_v10  ;;  %1634 = vmatpush1.bf16.msra.mxu1 %v3912_v11 }
 0x32c   : > { %1594 = vmatprep.subr.bf16.mxu0 %v3913_v12  ;;  %1635 = vmatprep.subr.bf16.mxu1 %v3914_v13 }
 0x32f   : > { %1595 = vmatpush1.bf16.msra.mxu0 %v3915_v14  ;;  %1636 = vmatpush1.bf16.msra.mxu1 %v3916_v15 }
 0x330   : > { %1672 = vmatprep.subr.bf16.mxu0 %v2556_v16  ;;  %1713 = vmatprep.subr.bf16.mxu1 %v2557_v17 }
 0x3a5   : > { %v1352_v18 = vpop.f32.mrb[12].mxu0  ;;  %v1393_v19 = vpop.f32.mrb[12].mxu1 }
 0x3a6   : > { %v1353_v23 = vadd.f32 %v1352_v18, %v3917_v60  ;;  %v1354_v24 = vpop.f32.mrb[13].mxu0  ;;  %v1395_v25 = vpop.f32.mrb[13].mxu1  ;;  %v1394_v38 = vadd.f32 %v1393_v19, %v3919_v37  ;;  %v2161_v18 = vld [vmem:[%s2986_s5 + $0x10] sm:$0xff] }
 0x3a7   : > { %v1355_v26 = vadd.f32 %v1354_v24, %v3405_v57  ;;  %v1356_v27 = vpop.f32.mrb[14].mxu0  ;;  %v1397_v28 = vpop.f32.mrb[14].mxu1  ;;  %v1396_v34 = vadd.f32 %v1395_v25, %v3918_v33 }
 0x3a8   : > { %v2158_v29 = vmul.f32 -1.442695, %v1353_v23  ;;  %v1357_v30 = vpop.f32.mrb[15].mxu0  ;;  %v1398_v31 = vpop.f32.mrb[15].mxu1 }
 0x3a9   : > { %v2159_v32 = vmul.f32 -1.442695, %v1355_v26  ;;  %v2160_v36 = vmul.f32 -1.442695, %v1396_v34 }
 0x3aa   : > { %2458 = vpow2.f32 %v2158_v29 }
 0x3ab   : > { %2460 = vpow2.f32 %v2159_v32 }
 0x3ac   : > { %2462 = vpow2.f32 %v2160_v36 }
 0x3ad   : > { %2464 = vtanh.f32 %v1394_v38 }
 0x3b4   : > { %v2459_v39 = vpop.eup %2458 }
 0x3b5   : > { %v2461_v41 = vpop.eup %2460  ;;  %v1403_v42 = vadd.f32 1.0, %v2459_v39 }
 0x3b6   : > { %v1409_v43 = vadd.f32 1.0, %v2461_v41  ;;  %v2463_v44 = vpop.eup %2462 }
 0x3b7   : > { %2466 = vrcp.f32 %v1403_v42  ;;  %v2465_v45 = vpop.eup %2464  ;;  %v1416_v49 = vadd.f32 1.0, %v2463_v44 }
 0x3b8   : > { %2468 = vrcp.f32 %v1409_v43 }
 0x3b9   : > { %2470 = vrcp.f32 %v1416_v49 }
 0x3c1   : > { %v2467_v46 = vpop.eup %2466 }
 0x3c2   : > { %v2469_v47 = vpop.eup %2468  ;;  %v1420_v48 = vmul.f32 %v2467_v46, %v2465_v45 }
 0x3c3   : > { %v1419_v5 = vmul.f32 %v2469_v47, %v3417_v53  ;;  %v2471_v26 = vpop.eup %2470 }
 0x3c5   : > { %v1460_v6 = vpop.f32.mrb[16].mxu0  ;;  %v1501_v7 = vpop.f32.mrb[16].mxu1  ;;  %v3564_v8 = vadd.f32 %v1420_v48, %v1419_v5 }
 0x3c6   : > { %v1462_v9 = vpop.f32.mrb[17].mxu0  ;;  %v1503_v10 = vpop.f32.mrb[17].mxu1 }
 0x3c7   : > { %v1512_v11 = vcombine.low %v1460_v6, %v1462_v9  ;;  %v1513_v12 = vcombine.low %v1501_v7, %v1503_v10  ;;  %v1464_v13 = vpop.f32.mrb[18].mxu0  ;;  %v1505_v14 = vpop.f32.mrb[18].mxu1  ;;  %2472 = vtanh.f32 %v3564_v8  ;;  %v2578_v10 = vld [vmem:[#allocation9 + $0x44] ss:$16 sps:$4 sm:$0xff]  }
 0x3c8   : > { %v1465_v15 = vpop.f32.mrb[19].mxu0  ;;  %v1506_v16 = vpop.f32.mrb[19].mxu1  ;;  %v2581_v13 = vld [vmem:[#allocation9 + $0x48] ss:$16 sps:$4 sm:$0xff]   ;;  %v2582_v14 = vld [vmem:[#allocation9 + $0x64] ss:$16 sps:$4 sm:$0xff]  }
 0x3c9   : > { %v1520_v17 = vrot.slane %v1512_v11, %v3292_v0  ;;  %v1527_v53 = vrot.slane %v1513_v12, %v3292_v0  ;;  %v2579_v11 = vld [vmem:[#allocation9 + $0x4c] ss:$16 sps:$4 sm:$0xff]   ;;  %v2580_v12 = vld [vmem:[#allocation9 + $0x40] ss:$16 sps:$4 sm:$0xff]  }
 0x3ca   : > { %v2583_v15 = vld [vmem:[#allocation9 + $0x6c] ss:$16 sps:$4 sm:$0xff]   ;;  %v2584_v16 = vld [vmem:[#allocation9 + $0x60] ss:$16 sps:$4 sm:$0xff]  }
 0x3cb   : > { %v1528_v19 = vcombine.low %v1520_v17, %v1527_v53  ;;  %v2585_v17 = vld [vmem:[#allocation9 + $0x68] ss:$16 sps:$4 sm:$0xff]   ;;  %v2586_v53 = vld [vmem:[#allocation9 + $0x84] ss:$16 sps:$4 sm:$0xff]  }
 0x3cd   : > { %v1530_v23 = vadd.f32 %v2161_v18, %v1528_v19  ;;  %v2587_v18 = vld [vmem:[#allocation9 + $0x8c] ss:$16 sps:$4 sm:$0xff]   ;;  %v2588_v19 = vld [vmem:[#allocation9 + $0x80] ss:$16 sps:$4 sm:$0xff]  }
 0x3cf   : > { %v2162_v24 = vmul.f32 -1.442695, %v1530_v23  ;;  %v1538_v25 = vrot.slane %v1530_v23, 2  ;;  %v1549_v31 = vrot.slane %v1530_v23, 6  ;;  %v1546_v36 = vrot.slane %v1530_v23, 4 }
 0x3d0   : > { %v2589_v23 = vld [vmem:[#allocation9 + $0x88] ss:$16 sps:$4 sm:$0xff]  }
 0x3d1   : > { %v2473_v27 = vpop.eup %2472  ;;  %2474 = vpow2.f32 %v2162_v24  ;;  %v2163_v28 = vmul.f32 -1.442695, %v1538_v25  ;;  %v2164_v32 = vmul.f32 -1.442695, %v1549_v31  ;;  %v2590_v24 = vld [vmem:[#allocation9 + $0xa4] ss:$16 sps:$4 sm:$0xff]  }
 0x3d2   : > { %v1423_v29 = vmul.f32 %v2473_v27, %v2471_v26  ;;  %v2591_v25 = vld [vmem:[#allocation9 + $0xac] ss:$16 sps:$4 sm:$0xff]   ;;  %v2592_v26 = vld [vmem:[#allocation9 + $0xa0] ss:$16 sps:$4 sm:$0xff]   ;;  %v2593_v27 = vld [vmem:[#allocation9 + $0xa8] ss:$16 sps:$4 sm:$0xff]  }
 0x3d3   : > { %2476 = vpow2.f32 %v2163_v28  ;;  %v2594_v28 = vld [vmem:[#allocation9 + $0xc4] ss:$16 sps:$4 sm:$0xff]   ;;  %v2597_v31 = vld [vmem:[#allocation9 + $0xc8] ss:$16 sps:$4 sm:$0xff]  }
 0x3d4   : > { %v1563_v30 = vpack.c.bf16 %v1423_v29, %v1423_v29  ;;  %2478 = vpow2.f32 %v2164_v32  ;;  %v2595_v29 = vld [vmem:[#allocation9 + $0xcc] ss:$16 sps:$4 sm:$0xff]   ;;  %v2598_v32 = vld [vmem:[#allocation9 + $0xe4] ss:$16 sps:$4 sm:$0xff]  }
 0x3d6   : > { %1596 = vmatprep.mubr.bf16.mxu0 %v1563_v30  ;;  %1637 = vmatprep.mubr.bf16.mxu1 %v1563_v30  ;;  %v2596_v30 = vld [vmem:[#allocation9 + $0xc0] ss:$16 sps:$4 sm:$0xff]  }
 0x3db   : > { %v2475_v34 = vpop.eup %2474 }
 0x3dc   : > { %v1534_v38 = vadd.f32 1.0, %v2475_v34  ;;  %v2599_v34 = vld [vmem:[#allocation9 + $0xec] ss:$16 sps:$4 sm:$0xff]  }
 0x3dd   : > { %v2477_v39 = vpop.eup %2476 }
 0x3de   : > { %2480 = vrcp.f32 %v1534_v38  ;;  %v1543_v41 = vadd.f32 1.0, %v2477_v39  ;;  %v2479_v42 = vpop.eup %2478  ;;  %v2601_v38 = vld [vmem:[#allocation9 + $0xe8] ss:$16 sps:$4 sm:$0xff]   ;;  %v2602_v39 = vld [vmem:[#allocation9 + $0x104] ss:$16 sps:$4 sm:$0xff]  }
 0x3df   : > { %2482 = vtanh.f32 %v1546_v36  ;;  %v1554_v46 = vadd.f32 1.0, %v2479_v42  ;;  %v2600_v36 = vld [vmem:[#allocation9 + $0xe0] ss:$16 sps:$4 sm:$0xff]  }
 0x3e0   : > { %2484 = vrcp.f32 %v1543_v41  ;;  %v2603_v41 = vld [vmem:[#allocation9 + $0x10c] ss:$16 sps:$4 sm:$0xff]   ;;  %v2604_v42 = vld [vmem:[#allocation9 + $0x100] ss:$16 sps:$4 sm:$0xff]  }
 0x3e1   : > { %2486 = vrcp.f32 %v1554_v46  ;;  %v2608_v46 = vld [vmem:[#allocation9 + $0x120] ss:$16 sps:$4 sm:$0xff]  }
 0x3e8   : > { %v2481_v43 = vpop.eup %2480 }
 0x3e9   : > { %v2483_v44 = vpop.eup %2482 }
 0x3ea   : > { %v2485_v45 = vpop.eup %2484  ;;  %v1558_v48 = vmul.f32 %v2483_v44, %v2481_v43  ;;  %v2605_v43 = vld [vmem:[#allocation9 + $0x108] ss:$16 sps:$4 sm:$0xff]   ;;  %v2606_v44 = vld [vmem:[#allocation9 + $0x124] ss:$16 sps:$4 sm:$0xff]  }
 0x3eb   : > { %v1557_v47 = vmul.f32 %v2485_v45, %v3424_v40  ;;  %v2487_v5 = vpop.eup %2486  ;;  %v2559_v40 = vld [vmem:[#allocation7 + $0xac] ss:$16 sps:$4 sm:$0xff]  }
 0x3ec   : > { %v2607_v45 = vld [vmem:[#allocation9 + $0x12c] ss:$16 sps:$4 sm:$0xff]  }
 0x3ed   : > { %v3571_v49 = vadd.f32 %v1558_v48, %v1557_v47  ;;  %v2609_v47 = vld [vmem:[#allocation9 + $0x128] ss:$16 sps:$4 sm:$0xff]   ;;  %v2610_v48 = vld [vmem:[#allocation9 + $0x144] ss:$16 sps:$4 sm:$0xff]  }
 0x3ef   : > { %2488 = vtanh.f32 %v3571_v49 }
 0x3f9   : > { %v2489_v6 = vpop.eup %2488 }
 0x3fa   : > { %v1561_v7 = vmul.f32 %v2489_v6, %v2487_v5  ;;  %v2611_v5 = vld [vmem:[#allocation9 + $0x14c] ss:$16 sps:$4 sm:$0xff]   ;;  %v2612_v6 = vld [vmem:[#allocation9 + $0x140] ss:$16 sps:$4 sm:$0xff]  }
 0x3fc   : > { %v1562_v9 = vpack.c.bf16 %v1561_v7, %v1561_v7  ;;  %v2613_v7 = vld [vmem:[#allocation9 + $0x148] ss:$16 sps:$4 sm:$0xff]  }
 0x3fe   : > { %1597 = vmatmul.mubr.bf16.vlgmr.msra.gmra.mrb[20].mxu0 %v1562_v9  ;;  %1638 = vmatmul.mubr.bf16.vlgmr.msra.gmra.mrb[20].mxu1 %v1562_v9 }
 0x3ff   : > { %1673 = vmatpush1.bf16.msra.mxu0 %v3427_v54  ;;  %1714 = vmatpush1.bf16.msra.mxu1 %v3430_v20  ;;  %v2560_v54 = vld [vmem:[#allocation7 + $0xa0] ss:$16 sps:$4 sm:$0xff]   ;;  %v2561_v20 = vld [vmem:[#allocation7 + $0xa8] ss:$16 sps:$4 sm:$0xff]  }
 0x400   : > { %1674 = vmatprep.subr.bf16.mxu0 %v3433_v62  ;;  %1715 = vmatprep.subr.bf16.mxu1 %v3436_v2  ;;  %v2562_v62 = vld [vmem:[#allocation7 + $0xc4] ss:$16 sps:$4 sm:$0xff]   ;;  %v2563_v2 = vld [vmem:[#allocation7 + $0xcc] ss:$16 sps:$4 sm:$0xff]  }
 0x401   : > { %1704 = vmatprep.mubr.bf16.mxu0 %v3823_v1  ;;  %1745 = vmatprep.mubr.bf16.mxu1 %v3823_v1  ;;  %v2558_v1 = vld [vmem:[#allocation7 + $0xa4] ss:$16 sps:$4 sm:$0xff]  }
 0x403   : > { %1675 = vmatpush1.bf16.msra.mxu0 %v3441_v35  ;;  %1716 = vmatpush1.bf16.msra.mxu1 %v3444_v56  ;;  %v2564_v35 = vld [vmem:[#allocation7 + $0xc0] ss:$16 sps:$4 sm:$0xff]   ;;  %v2565_v56 = vld [vmem:[#allocation7 + $0xc8] ss:$16 sps:$4 sm:$0xff]  }
 0x404   : > { %1676 = vmatprep.subr.bf16.mxu0 %v3447_v55  ;;  %1717 = vmatprep.subr.bf16.mxu1 %v3450_v4  ;;  %v2566_v55 = vld [vmem:[#allocation7 + $0xe4] ss:$16 sps:$4 sm:$0xff]   ;;  %v2567_v4 = vld [vmem:[#allocation7 + $0xec] ss:$16 sps:$4 sm:$0xff]  }
 0x407   : > { %1677 = vmatpush1.bf16.msra.mxu0 %v3453_v58  ;;  %1718 = vmatpush1.bf16.msra.mxu1 %v3456_v63  ;;  %v2568_v58 = vld [vmem:[#allocation7 + $0xe0] ss:$16 sps:$4 sm:$0xff]   ;;  %v2569_v63 = vld [vmem:[#allocation7 + $0xe8] ss:$16 sps:$4 sm:$0xff]  }
 0x408   : > { %1678 = vmatprep.subr.bf16.mxu0 %v3459_v3  ;;  %1719 = vmatprep.subr.bf16.mxu1 %v3462_v59  ;;  %v2570_v3 = vld [vmem:[#allocation9 + $0x4] ss:$16 sps:$4 sm:$0xff]   ;;  %v2571_v59 = vld [vmem:[#allocation9 + $0xc] ss:$16 sps:$4 sm:$0xff]  }
 0x40b   : > { %1679 = vmatpush1.bf16.msra.mxu0 %v3465_v61  ;;  %1720 = vmatpush1.bf16.msra.mxu1 %v3468_v51  ;;  %v2572_v61 = vld [vmem:[#allocation9] ss:$16 sps:$4 sm:$0xff]   ;;  %v2573_v51 = vld [vmem:[#allocation9 + $0x8] ss:$16 sps:$4 sm:$0xff]  }
 0x40c   : > { %1680 = vmatprep.subr.bf16.mxu0 %v3471_v50  ;;  %1721 = vmatprep.subr.bf16.mxu1 %v3474_v22  ;;  %v2574_v50 = vld [vmem:[#allocation9 + $0x24] ss:$16 sps:$4 sm:$0xff]   ;;  %v2575_v22 = vld [vmem:[#allocation9 + $0x2c] ss:$16 sps:$4 sm:$0xff]  }
 0x40f   : > { %1681 = vmatpush1.bf16.msra.mxu0 %v3477_v21  ;;  %1722 = vmatpush1.bf16.msra.mxu1 %v3480_v52  ;;  %v2576_v21 = vld [vmem:[#allocation9 + $0x20] ss:$16 sps:$4 sm:$0xff]   ;;  %v2577_v52 = vld [vmem:[#allocation9 + $0x28] ss:$16 sps:$4 sm:$0xff]  }
 0x410   : > { %1682 = vmatprep.subr.bf16.mxu0 %v2558_v1  ;;  %1723 = vmatprep.subr.bf16.mxu1 %v2559_v40  ;;  %v2615_v1 = vld [vmem:[#allocation9 + $0x16c] ss:$16 sps:$4 sm:$0xff]   ;;  %v2616_v40 = vld [vmem:[#allocation9 + $0x160] ss:$16 sps:$4 sm:$0xff]  }
 0x413   : > { %1683 = vmatpush1.bf16.msra.mxu0 %v2560_v54  ;;  %1724 = vmatpush1.bf16.msra.mxu1 %v2561_v20  ;;  %v2617_v54 = vld [vmem:[#allocation9 + $0x168] ss:$16 sps:$4 sm:$0xff]   ;;  %v2618_v20 = vld [vmem:[#allocation9 + $0x184] ss:$16 sps:$4 sm:$0xff]  }
 0x414   : > { %1684 = vmatprep.subr.bf16.mxu0 %v2562_v62  ;;  %1725 = vmatprep.subr.bf16.mxu1 %v2563_v2  ;;  %v2619_v62 = vld [vmem:[#allocation9 + $0x18c] ss:$16 sps:$4 sm:$0xff]   ;;  %v2620_v2 = vld [vmem:[#allocation9 + $0x180] ss:$16 sps:$4 sm:$0xff]  }
 0x417   : > { %1685 = vmatpush1.bf16.msra.mxu0 %v2564_v35  ;;  %1726 = vmatpush1.bf16.msra.mxu1 %v2565_v56  ;;  %v2621_v35 = vld [vmem:[#allocation9 + $0x188] ss:$16 sps:$4 sm:$0xff]   ;;  %v2622_v56 = vld [vmem:[#allocation9 + $0x1a4] ss:$16 sps:$4 sm:$0xff]  }
 0x418   : > { %1686 = vmatprep.subr.bf16.mxu0 %v2566_v55  ;;  %1727 = vmatprep.subr.bf16.mxu1 %v2567_v4  ;;  %v2623_v55 = vld [vmem:[#allocation9 + $0x1ac] ss:$16 sps:$4 sm:$0xff]   ;;  %v2624_v4 = vld [vmem:[#allocation9 + $0x1a0] ss:$16 sps:$4 sm:$0xff]  }
 0x41b   : > { %1687 = vmatpush1.bf16.msra.mxu0 %v2568_v58  ;;  %1728 = vmatpush1.bf16.msra.mxu1 %v2569_v63  ;;  %v2625_v58 = vld [vmem:[#allocation9 + $0x1a8] ss:$16 sps:$4 sm:$0xff]   ;;  %v2626_v63 = vld [vmem:[#allocation9 + $0x1c4] ss:$16 sps:$4 sm:$0xff]  }
 0x41c   : > { %1810 = vmatprep.subr.bf16.mxu0 %v2570_v3  ;;  %1851 = vmatprep.subr.bf16.mxu1 %v2571_v59  ;;  %v2627_v3 = vld [vmem:[#allocation9 + $0x1cc] ss:$16 sps:$4 sm:$0xff]   ;;  %v2628_v59 = vld [vmem:[#allocation9 + $0x1c0] ss:$16 sps:$4 sm:$0xff]  }
 0x41e   : > { %1705 = vmatmul.mubr.bf16.vlgmr.msra.gmra.mrb[24].mxu0 %v1562_v9  ;;  %1746 = vmatmul.mubr.bf16.vlgmr.msra.gmra.mrb[24].mxu1 %v1562_v9  ;;  %v2614_v9 = vld [vmem:[#allocation9 + $0x164] ss:$16 sps:$4 sm:$0xff]  }
 0x41f   : > { %1811 = vmatpush1.bf16.msra.mxu0 %v2572_v61  ;;  %1852 = vmatpush1.bf16.msra.mxu1 %v2573_v51  ;;  %v2629_v61 = vld [vmem:[#allocation9 + $0x1c8] ss:$16 sps:$4 sm:$0xff]   ;;  %v2630_v51 = vld [vmem:[#allocation9 + $0x1e4] ss:$16 sps:$4 sm:$0xff]  }
 0x420   : > { %1812 = vmatprep.subr.bf16.mxu0 %v2574_v50  ;;  %1853 = vmatprep.subr.bf16.mxu1 %v2575_v22  ;;  %v2631_v50 = vld [vmem:[#allocation9 + $0x1ec] ss:$16 sps:$4 sm:$0xff]   ;;  %v2632_v22 = vld [vmem:[#allocation9 + $0x1e0] ss:$16 sps:$4 sm:$0xff]  }
 0x423   : > { %1813 = vmatpush1.bf16.msra.mxu0 %v2576_v21  ;;  %1854 = vmatpush1.bf16.msra.mxu1 %v2577_v52  ;;  %v2633_v21 = vld [vmem:[#allocation9 + $0x1e8] ss:$16 sps:$4 sm:$0xff]  }
 0x424   : > { %1814 = vmatprep.subr.bf16.mxu0 %v2578_v10  ;;  %1855 = vmatprep.subr.bf16.mxu1 %v2579_v11 }
 0x427   : > { %1815 = vmatpush1.bf16.msra.mxu0 %v2580_v12  ;;  %1856 = vmatpush1.bf16.msra.mxu1 %v2581_v13 }
 0x428   : > { %1816 = vmatprep.subr.bf16.mxu0 %v2582_v14  ;;  %1857 = vmatprep.subr.bf16.mxu1 %v2583_v15 }
 0x42b   : > { %1817 = vmatpush1.bf16.msra.mxu0 %v2584_v16  ;;  %1858 = vmatpush1.bf16.msra.mxu1 %v2585_v17 }
 0x42c   : > { %1818 = vmatprep.subr.bf16.mxu0 %v2586_v53  ;;  %1859 = vmatprep.subr.bf16.mxu1 %v2587_v18 }
 0x42f   : > { %1819 = vmatpush1.bf16.msra.mxu0 %v2588_v19  ;;  %1860 = vmatpush1.bf16.msra.mxu1 %v2589_v23 }
 0x430   : > { %1820 = vmatprep.subr.bf16.mxu0 %v2590_v24  ;;  %1861 = vmatprep.subr.bf16.mxu1 %v2591_v25 }
 0x433   : > { %1821 = vmatpush1.bf16.msra.mxu0 %v2592_v26  ;;  %1862 = vmatpush1.bf16.msra.mxu1 %v2593_v27 }
 0x434   : > { %1822 = vmatprep.subr.bf16.mxu0 %v2594_v28  ;;  %1863 = vmatprep.subr.bf16.mxu1 %v2595_v29 }
 0x437   : > { %1823 = vmatpush1.bf16.msra.mxu0 %v2596_v30  ;;  %1864 = vmatpush1.bf16.msra.mxu1 %v2597_v31 }
 0x438   : > { %1824 = vmatprep.subr.bf16.mxu0 %v2598_v32  ;;  %1865 = vmatprep.subr.bf16.mxu1 %v2599_v34 }
 0x43b   : > { %1825 = vmatpush1.bf16.msra.mxu0 %v2600_v36  ;;  %1866 = vmatpush1.bf16.msra.mxu1 %v2601_v38 }
 0x43c   : > { %1826 = vmatprep.subr.bf16.mxu0 %v2602_v39  ;;  %1867 = vmatprep.subr.bf16.mxu1 %v2603_v41 }
 0x43f   : > { %1827 = vmatpush1.bf16.msra.mxu0 %v2604_v42  ;;  %1868 = vmatpush1.bf16.msra.mxu1 %v2605_v43 }
 0x440   : > { %1828 = vmatprep.subr.bf16.mxu0 %v2606_v44  ;;  %1869 = vmatprep.subr.bf16.mxu1 %v2607_v45 }
 0x443   : > { %1829 = vmatpush1.bf16.msra.mxu0 %v2608_v46  ;;  %1870 = vmatpush1.bf16.msra.mxu1 %v2609_v47 }
 0x444   : > { %1830 = vmatprep.subr.bf16.mxu0 %v2610_v48  ;;  %1871 = vmatprep.subr.bf16.mxu1 %v2611_v5 }
 0x447   : > { %1831 = vmatpush1.bf16.msra.mxu0 %v2612_v6  ;;  %1872 = vmatpush1.bf16.msra.mxu1 %v2613_v7 }
 0x448   : > { %1832 = vmatprep.subr.bf16.mxu0 %v2614_v9  ;;  %1873 = vmatprep.subr.bf16.mxu1 %v2615_v1  ;;  %v2168_v1 = vld [vmem:[%s2986_s5 + $0x18] sm:$0xff] }
 0x44b   : > { %1833 = vmatpush1.bf16.msra.mxu0 %v2616_v40  ;;  %1874 = vmatpush1.bf16.msra.mxu1 %v2617_v54 }
 0x44c   : > { %1834 = vmatprep.subr.bf16.mxu0 %v2618_v20  ;;  %1875 = vmatprep.subr.bf16.mxu1 %v2619_v62 }
 0x44f   : > { %1835 = vmatpush1.bf16.msra.mxu0 %v2620_v2  ;;  %1876 = vmatpush1.bf16.msra.mxu1 %v2621_v35 }
 0x450   : > { %1836 = vmatprep.subr.bf16.mxu0 %v2622_v56  ;;  %1877 = vmatprep.subr.bf16.mxu1 %v2623_v55 }
 0x453   : > { %1837 = vmatpush1.bf16.msra.mxu0 %v2624_v4  ;;  %1878 = vmatpush1.bf16.msra.mxu1 %v2625_v58 }
 0x454   : > { %1838 = vmatprep.subr.bf16.mxu0 %v2626_v63  ;;  %1879 = vmatprep.subr.bf16.mxu1 %v2627_v3 }
 0x457   : > { %1839 = vmatpush1.bf16.msra.mxu0 %v2628_v59  ;;  %1880 = vmatpush1.bf16.msra.mxu1 %v2629_v61 }
 0x458   : > { %1840 = vmatprep.subr.bf16.mxu0 %v2630_v51  ;;  %1881 = vmatprep.subr.bf16.mxu1 %v2631_v50 }
 0x45b   : > { %1841 = vmatpush1.bf16.msra.mxu0 %v2632_v22  ;;  %1882 = vmatpush1.bf16.msra.mxu1 %v2633_v21 }
 0x4d1   : > { %v1598_v52 = vpop.f32.mrb[20].mxu0  ;;  %v1639_v10 = vpop.f32.mrb[20].mxu1 }
 0x4d2   : > { %v1599_v11 = vadd.f32 %v1598_v52, %v3917_v60  ;;  %v1600_v12 = vpop.f32.mrb[21].mxu0  ;;  %v1641_v13 = vpop.f32.mrb[21].mxu1  ;;  %v1640_v25 = vadd.f32 %v1639_v10, %v3919_v37 }
 0x4d3   : > { %v1601_v14 = vadd.f32 %v1600_v12, %v3405_v57  ;;  %v1602_v15 = vpop.f32.mrb[22].mxu0  ;;  %v1643_v16 = vpop.f32.mrb[22].mxu1  ;;  %v1642_v23 = vadd.f32 %v1641_v13, %v3918_v33 }
 0x4d4   : > { %v2165_v17 = vmul.f32 -1.442695, %v1599_v11  ;;  %v1603_v53 = vpop.f32.mrb[23].mxu0  ;;  %v1644_v18 = vpop.f32.mrb[23].mxu1 }
 0x4d5   : > { %v2166_v19 = vmul.f32 -1.442695, %v1601_v14  ;;  %v2167_v24 = vmul.f32 -1.442695, %v1642_v23 }
 0x4d6   : > { %2490 = vpow2.f32 %v2165_v17 }
 0x4d7   : > { %2492 = vpow2.f32 %v2166_v19 }
 0x4d8   : > { %2494 = vpow2.f32 %v2167_v24 }
 0x4d9   : > { %2496 = vtanh.f32 %v1640_v25 }
 0x4e0   : > { %v2491_v26 = vpop.eup %2490 }
 0x4e1   : > { %v2493_v27 = vpop.eup %2492  ;;  %v1649_v28 = vadd.f32 1.0, %v2491_v26 }
 0x4e2   : > { %v1655_v29 = vadd.f32 1.0, %v2493_v27  ;;  %v2495_v30 = vpop.eup %2494 }
 0x4e3   : > { %2498 = vrcp.f32 %v1649_v28  ;;  %v2497_v31 = vpop.eup %2496  ;;  %v1662_v38 = vadd.f32 1.0, %v2495_v30 }
 0x4e4   : > { %2500 = vrcp.f32 %v1655_v29 }
 0x4e5   : > { %2502 = vrcp.f32 %v1662_v38 }
 0x4ed   : > { %v2499_v32 = vpop.eup %2498 }
 0x4ee   : > { %v2501_v34 = vpop.eup %2500  ;;  %v1666_v36 = vmul.f32 %v2499_v32, %v2497_v31 }
 0x4ef   : > { %v1665_v39 = vmul.f32 %v2501_v34, %v3564_v8  ;;  %v2503_v2 = vpop.eup %2502 }
 0x4f1   : > { %v1706_v41 = vpop.f32.mrb[24].mxu0  ;;  %v1747_v42 = vpop.f32.mrb[24].mxu1  ;;  %v3599_v43 = vadd.f32 %v1666_v36, %v1665_v39 }
 0x4f2   : > { %v1708_v44 = vpop.f32.mrb[25].mxu0  ;;  %v1749_v45 = vpop.f32.mrb[25].mxu1 }
 0x4f3   : > { %v1758_v46 = vcombine.low %v1706_v41, %v1708_v44  ;;  %v1759_v47 = vcombine.low %v1747_v42, %v1749_v45  ;;  %v1710_v48 = vpop.f32.mrb[26].mxu0  ;;  %v1751_v5 = vpop.f32.mrb[26].mxu1  ;;  %2504 = vtanh.f32 %v3599_v43 }
 0x4f4   : > { %v1711_v6 = vpop.f32.mrb[27].mxu0  ;;  %v1752_v7 = vpop.f32.mrb[27].mxu1 }
 0x4f5   : > { %v1766_v9 = vrot.slane %v1758_v46, %v3292_v0  ;;  %v1773_v8 = vrot.slane %v1759_v47, %v3292_v0  ;;  %v2176_v6 = vld [vmem:[%s3640_s4] ss:$0 sm:$0xff] (!%p2175_p9) }
 0x4f7   : > { %v1774_v40 = vcombine.low %v1766_v9, %v1773_v8 }
 0x4f9   : > { %v1776_v54 = vadd.f32 %v2168_v1, %v1774_v40 }
 0x4fb   : > { %v2169_v20 = vmul.f32 -1.442695, %v1776_v54  ;;  %v1784_v62 = vrot.slane %v1776_v54, 2  ;;  %v1795_v58 = vrot.slane %v1776_v54, 6  ;;  %v1792_v59 = vrot.slane %v1776_v54, 4 }
 0x4fd   : > { %v2505_v35 = vpop.eup %2504  ;;  %2506 = vpow2.f32 %v2169_v20  ;;  %v2170_v56 = vmul.f32 -1.442695, %v1784_v62  ;;  %v2171_v63 = vmul.f32 -1.442695, %v1795_v58 }
 0x4fe   : > { %v1669_v55 = vmul.f32 %v2505_v35, %v2503_v2 }
 0x4ff   : > { %2508 = vpow2.f32 %v2170_v56 }
 0x500   : > { %v1809_v4 = vpack.c.bf16 %v1669_v55, %v1669_v55  ;;  %2510 = vpow2.f32 %v2171_v63 }
 0x502   : > { %1842 = vmatprep.mubr.bf16.mxu0 %v1809_v4  ;;  %1883 = vmatprep.mubr.bf16.mxu1 %v1809_v4 }
 0x507   : > { %v2507_v3 = vpop.eup %2506 }
 0x508   : > { %v1780_v61 = vadd.f32 1.0, %v2507_v3 }
 0x509   : > { %v2509_v0 = vpop.eup %2508 }
 0x50a   : > { %2512 = vrcp.f32 %v1780_v61  ;;  %v1789_v51 = vadd.f32 1.0, %v2509_v0  ;;  %v2511_v50 = vpop.eup %2510 }
 0x50b   : > { %2514 = vtanh.f32 %v1792_v59  ;;  %v1800_v10 = vadd.f32 1.0, %v2511_v50 }
 0x50c   : > { %2516 = vrcp.f32 %v1789_v51 }
 0x50d   : > { %2518 = vrcp.f32 %v1800_v10 }
 0x514   : > { %v2513_v22 = vpop.eup %2512 }
 0x515   : > { %v2515_v21 = vpop.eup %2514 }
 0x516   : > { %v2517_v52 = vpop.eup %2516  ;;  %v1804_v12 = vmul.f32 %v2515_v21, %v2513_v22 }
 0x517   : > { %v1803_v11 = vmul.f32 %v2517_v52, %v3571_v49  ;;  %v2519_v14 = vpop.eup %2518 }
 0x519   : > { %v1805_v13 = vadd.f32 %v1804_v12, %v1803_v11 }
 0x51b   : > { %2520 = vtanh.f32 %v1805_v13  ;;  %1917 = vst [vmem:[#allocation3] sm:$0x3] %v1805_v13 }
 0x525   : > { %v2521_v15 = vpop.eup %2520 }
 0x526   : > { %v1807_v16 = vmul.f32 %v2521_v15, %v2519_v14 }
 0x528   : > { %v1808_v17 = vpack.c.bf16 %v1807_v16, %v1807_v16  ;;  %1916 = vst [vmem:[#allocation2] sm:$0x3] %v1807_v16 }
 0x52a   : > { %1843 = vmatmul.mubr.bf16.vlgmr.msra.gmra.mrb[28].mxu0 %v1808_v17  ;;  %1884 = vmatmul.mubr.bf16.vlgmr.msra.gmra.mrb[28].mxu1 %v1808_v17 }
 0x5fd   : > { %v1844_v53 = vpop.f32.mrb[28].mxu0  ;;  %v1885_v18 = vpop.f32.mrb[28].mxu1 }
 0x5fe   : > { %v1845_v19 = vadd.f32 %v1844_v53, %v3917_v60  ;;  %v1846_v23 = vpop.f32.mrb[29].mxu0  ;;  %v1887_v24 = vpop.f32.mrb[29].mxu1  ;;  %v1886_v34 = vadd.f32 %v1885_v18, %v3919_v37 }
 0x5ff   : > { %v1847_v49 = vadd.f32 %v1846_v23, %v3405_v57  ;;  %v1848_v25 = vpop.f32.mrb[30].mxu0  ;;  %v1889_v26 = vpop.f32.mrb[30].mxu1  ;;  %v1888_v31 = vadd.f32 %v1887_v24, %v3918_v33 }
 0x600   : > { %v2172_v27 = vmul.f32 -1.442695, %v1845_v19  ;;  %v1849_v28 = vpop.f32.mrb[31].mxu0  ;;  %v1890_v29 = vpop.f32.mrb[31].mxu1 }
 0x601   : > { %v2173_v30 = vmul.f32 -1.442695, %v1847_v49  ;;  %v2174_v32 = vmul.f32 -1.442695, %v1888_v31 }
 0x602   : > { %2522 = vpow2.f32 %v2172_v27 }
 0x603   : > { %2524 = vpow2.f32 %v2173_v30 }
 0x604   : > { %2526 = vpow2.f32 %v2174_v32 }
 0x605   : > { %2528 = vtanh.f32 %v1886_v34 }
 0x60c   : > { %v2523_v36 = vpop.eup %2522 }
 0x60d   : > { %v2525_v38 = vpop.eup %2524  ;;  %v1895_v60 = vadd.f32 1.0, %v2523_v36 }
 0x60e   : > { %v1901_v39 = vadd.f32 1.0, %v2525_v38  ;;  %v2527_v57 = vpop.eup %2526 }
 0x60f   : > { %2530 = vrcp.f32 %v1895_v60  ;;  %v2529_v41 = vpop.eup %2528  ;;  %v1908_v46 = vadd.f32 1.0, %v2527_v57 }
 0x610   : > { %2532 = vrcp.f32 %v1901_v39 }
 0x611   : > { %2534 = vrcp.f32 %v1908_v46 }
 0x619   : > { %v2531_v42 = vpop.eup %2530 }
 0x61a   : > { %v2533_v44 = vpop.eup %2532  ;;  %v1912_v45 = vmul.f32 %v2531_v42, %v2529_v41 }
 0x61b   : > { %v1911_v47 = vmul.f32 %v2533_v44, %v3599_v43  ;;  %v2535_v37 = vpop.eup %2534  ;;  %v2177_v43 = vld [vmem:[#allocation4] ss:$0 sm:$0xff] (!%p2175_p9) }
 0x61d   : > { %v1913_v33 = vadd.f32 %v1912_v45, %v1911_v47 }
 0x61f   : > { %2536 = vtanh.f32 %v1913_v33  ;;  %1919 = vst [vmem:[#allocation3 + $0x2] sm:$0x3] %v1913_v33 }
 0x626   : > { %1923 = sbr.rel (%p2175_p9) target bundleno = 1728 (0x6c0), region = 64 }
 0x629   : > { %v2537_v48 = vpop.eup %2536 }
 0x62a   : > { %v1915_v5 = vmul.f32 %v2537_v48, %v2535_v37 }
 0x62c   : > { %1918 = vst [vmem:[#allocation2 + $0x2] sm:$0x3] %v1915_v5  ;;  %v1931_v7 = vmul.f32 (!%p2175_p9), %v2176_v6, %v1915_v5 }
 0x62e   : > { %v1933_v9 = vsel %vm1932_vm0, %v1931_v7, 0.0 }
 0x62f   : > { %1934 = vadd.xlane.f32.xlu0 %v1933_v9 }
 0x6bc   : > { %v1935_v8 = vpop.xlane.xlu0 %1934 }
 0x6bd   : > { %v1943_v1 = vadd.f32 %v2177_v43, %v1935_v8 }
 0x6bf   : > { %1945 = vst.msk [vmem:[%s3642_s6] sm:$0x3] %vm1944_vm1, %v1943_v1 }
 0x6c0 PF: > { %s22_s28 = sadd.s32 1, %s2774_s28   ;;  %s3920_s23 = smov %s2758_s24 }
 0x6c1   : > { %p19_p8 = scmp.ge.s32.totalorder %s22_s28, 4   ;;  %s3921_s24 = smov %s2762_s25 }
 0x6c2   : > { %s3922_s25 = smov %s2940_s13  ;;  %s3923_s26 = smov %s2770_s27 }
 0x6c3   : > { %s3924_s27 = smov %s3926_s20  ;;  %21 = sbr.rel (!%p19_p8) target bundleno = 8 (0x8), region = 105 }
 0x6ca   :  { %1965 = vsyncpa [#allocation6], 1 }
 0x6cb   :  { %1967 = vsyncpa [#allocation6 + $0x1], 1 }
 0x6cc   :  { %1968 = vsyncpa [#allocation8], 1 }

</bundles_post_ra>
